<compile_context>
chip_gen: v7x
topology: tpu7x:2x2x1
jax: 0.10.0
libtpu: 0.0.40
codegen_flags: <defaults>
</compile_context>

<pallas_src>
import functools

import jax
import jax.numpy as jnp
from jax.experimental import pallas as pl
from jax.experimental.pallas import tpu as pltpu

INPUT_DIM = 784      # 28 * 28
HIDDEN_DIM = 400
LATENT_DIM = 20

HID_PAD = 512        # 400 -> 4 * 128 lanes
LAT_PAD = 128        # 20  -> 128 lanes (mu and logvar each get one full tile)
OUT_PAD = 896        # 784 -> 7 * 128 lanes

SUBLANE_ALIGN = 16   # bf16 streams pack 16 rows per sublane-group


def _leaky_relu(x, slope=0.2):
    return jnp.where(x > 0, x, slope * x)


def _round_up(n, m):
    return ((n + m - 1) // m) * m


# ----------------------------------------------------------------------------
# Kernel
# ----------------------------------------------------------------------------
def vae_kernel(x_ref, eps_ref,
               w1_ref, b1_ref,
               wmulv_ref, bmulv_ref,
               w3_ref, b3_ref,
               w4_ref, b4_ref,
               recon_ref, mulv_ref):
    f32 = jnp.float32
    bf16 = jnp.bfloat16

    # ---- encoder: fc1 + LeakyReLU(0.2) ----
    x = x_ref[...]                                                # (BT, 784) bf16
    h1 = jnp.dot(x, w1_ref[...],
                 preferred_element_type=f32) + b1_ref[...]        # (BT, 512) f32
    h1 = _leaky_relu(h1)

    # ---- fused [mu | logvar] projection (each half padded to 128 lanes) ----
    mulv = jnp.dot(h1.astype(bf16), wmulv_ref[...],
                   preferred_element_type=f32) + bmulv_ref[...]   # (BT, 256) f32
    mu = mulv[:, :LAT_PAD]                                        # (BT, 128)
    log_var = mulv[:, LAT_PAD:]                                   # (BT, 128)

    # ---- reparameterization trick (eps zero-padded beyond LATENT_DIM) ----
    std = jnp.exp(0.5 * log_var)
    z = mu + eps_ref[...] * std                                   # (BT, 128) f32

    # ---- decoder: fc3 + LeakyReLU, fc4 + sigmoid ----
    h3 = jnp.dot(z.astype(bf16), w3_ref[...],
                 preferred_element_type=f32) + b3_ref[...]        # (BT, 512) f32
    h3 = _leaky_relu(h3)
    logits = jnp.dot(h3.astype(bf16), w4_ref[...],
                     preferred_element_type=f32) + b4_ref[...]    # (BT, 896) f32
    # sigmoid via EUP: exp and approx-reciprocal both issue on the EUP slot,
    # keeping the 896-lane tile off the VPU divide path.
    recon = pl.reciprocal(1.0 + jnp.exp(-logits), approx=True)

    recon_ref[...] = recon.astype(recon_ref.dtype)                # bf16 writeback
    mulv_ref[...] = mulv                                          # f32 (KL precision)


# ----------------------------------------------------------------------------
# Parameter packing: pad / fuse / cast once, outside the jitted forward.
# ----------------------------------------------------------------------------
def pack_params(params):
    """PyTorch-layout params -> kernel layout (padded, fused, bf16 weights)."""
    w1, b1, wmu, bmu, wlv, blv, w3, b3, w4, b4 = params

    def pad2(a, rows, cols, dtype=jnp.float32):
        a = jnp.asarray(a, jnp.float32)
        a = jnp.pad(a, ((0, rows - a.shape[0]), (0, cols - a.shape[1])))
        return a.astype(dtype)

    w1p = pad2(w1, INPUT_DIM, HID_PAD, jnp.bfloat16)                  # (784, 512)
    b1p = pad2(b1, 1, HID_PAD)                                        # (1, 512)

    wmulv = jnp.concatenate(
        [pad2(wmu, HIDDEN_DIM, LAT_PAD), pad2(wlv, HIDDEN_DIM, LAT_PAD)], axis=1)
    wmulv = jnp.pad(
        wmulv, ((0, HID_PAD - HIDDEN_DIM), (0, 0))).astype(jnp.bfloat16)  # (512, 256)
    bmulv = jnp.concatenate(
        [pad2(bmu, 1, LAT_PAD), pad2(blv, 1, LAT_PAD)], axis=1)       # (1, 256)

    w3p = pad2(w3, LAT_PAD, HID_PAD, jnp.bfloat16)                    # (128, 512)
    b3p = pad2(b3, 1, HID_PAD)                                        # (1, 512)
    w4p = pad2(w4, HID_PAD, OUT_PAD, jnp.bfloat16)                    # (512, 896)
    b4p = pad2(b4, 1, OUT_PAD)                                        # (1, 896)
    return (w1p, b1p, wmulv, bmulv, w3p, b3p, w4p, b4p)


# ----------------------------------------------------------------------------
# Batch-tile selection
# ----------------------------------------------------------------------------
def _choose_bt(batch, block_b):
    """Pick a batch tile: <= block_b, multiple of 16, and (when the batch is
    big enough) small enough that the grid has >= 2 tiles so the 'parallel'
    batch axis shards across both v7x TensorCores."""
    rows = _round_up(batch, SUBLANE_ALIGN)
    bt = min(block_b, rows)
    if rows >= 2 * SUBLANE_ALIGN:
        half = _round_up((rows + 1) // 2, SUBLANE_ALIGN)
        bt = min(bt, half)
    return _round_up(bt, SUBLANE_ALIGN)


# ----------------------------------------------------------------------------
# Forward wrapper
# ----------------------------------------------------------------------------
@functools.partial(jax.jit, static_argnames=("block_b",))
def vae_forward(x, eps, packed_params, *, block_b=512):
    """x: (B, 28, 28); eps: (B, LATENT_DIM) standard-normal noise."""
    B = x.shape[0]
    # Stream x in bf16 (MXU consumes bf16 anyway) -> halves the dominant input DMA.
    x_flat = x.reshape(B, INPUT_DIM).astype(jnp.bfloat16)
    eps_pad = jnp.pad(eps.astype(jnp.float32),
                      ((0, 0), (0, LAT_PAD - LATENT_DIM)))

    bt = _choose_bt(B, block_b)
    b_pad = _round_up(B, bt)
    if b_pad != B:
        x_flat = jnp.pad(x_flat, ((0, b_pad - B), (0, 0)))
        eps_pad = jnp.pad(eps_pad, ((0, b_pad - B), (0, 0)))

    w1p, b1p, wmulv, bmulv, w3p, b3p, w4p, b4p = packed_params

    row = lambda i: (i, 0)     # batch-tiled operands
    const = lambda i: (0, 0)   # weights/biases: resident across all steps

    grid_spec = pltpu.PrefetchScalarGridSpec(
        num_scalar_prefetch=0,
        grid=(b_pad // bt,),
        in_specs=[
            pl.BlockSpec((bt, INPUT_DIM), row),           # x (bf16)
            pl.BlockSpec((bt, LAT_PAD), row),             # eps (padded, f32)
            pl.BlockSpec((INPUT_DIM, HID_PAD), const),    # w1 (bf16)
            pl.BlockSpec((1, HID_PAD), const),            # b1
            pl.BlockSpec((HID_PAD, 2 * LAT_PAD), const),  # [wmu|wlv] (bf16)
            pl.BlockSpec((1, 2 * LAT_PAD), const),        # [bmu|blv]
            pl.BlockSpec((LAT_PAD, HID_PAD), const),      # w3 (bf16)
            pl.BlockSpec((1, HID_PAD), const),            # b3
            pl.BlockSpec((HID_PAD, OUT_PAD), const),      # w4 (bf16)
            pl.BlockSpec((1, OUT_PAD), const),            # b4
        ],
        out_specs=(
            pl.BlockSpec((bt, OUT_PAD), row),             # recon (padded, bf16)
            pl.BlockSpec((bt, 2 * LAT_PAD), row),         # [mu|logvar] (padded, f32)
        ),
    )

    recon_pad, mulv = pl.pallas_call(
        vae_kernel,
        out_shape=(
            jax.ShapeDtypeStruct((b_pad, OUT_PAD), jnp.bfloat16),
            jax.ShapeDtypeStruct((b_pad, 2 * LAT_PAD), jnp.float32),
        ),
        grid_spec=grid_spec,
        compiler_params=pltpu.CompilerParams(
            dimension_semantics=("parallel",),
            vmem_limit_bytes=32 * 1024 * 1024),
    )(x_flat, eps_pad, w1p, b1p, wmulv, bmulv, w3p, b3p, w4p, b4p)

    # Slice away padding (reads bf16, writes f32 to keep module output dtype).
    recon = recon_pad[:B, :INPUT_DIM].astype(jnp.float32).reshape(B, 28, 28)
    mu = mulv[:B, :LATENT_DIM]
    log_var = mulv[:B, LAT_PAD:LAT_PAD + LATENT_DIM]
    return recon, mu, log_var


# ----------------------------------------------------------------------------
# Init + pure-JAX reference (matches the PyTorch module, f32 everywhere)
# ----------------------------------------------------------------------------
def init_params(key):
    ks = jax.random.split(key, 10)

    def linear(kw, kb, fan_in, fan_out):
        bound = 1.0 / jnp.sqrt(fan_in)
        w = jax.random.uniform(kw, (fan_in, fan_out), jnp.float32, -bound, bound)
        b = jax.random.uniform(kb, (1, fan_out), jnp.float32, -bound, bound)
        return w, b

    w1, b1 = linear(ks[0], ks[1], INPUT_DIM, HIDDEN_DIM)     # fc1
    wmu, bmu = linear(ks[2], ks[3], HIDDEN_DIM, LATENT_DIM)  # fc2_mu
    wlv, blv = linear(ks[4], ks[5], HIDDEN_DIM, LATENT_DIM)  # fc2_logvar
    w3, b3 = linear(ks[6], ks[7], LATENT_DIM, HIDDEN_DIM)    # fc3
    w4, b4 = linear(ks[8], ks[9], HIDDEN_DIM, INPUT_DIM)     # fc4
    return (w1, b1, wmu, bmu, wlv, blv, w3, b3, w4, b4)


def vae_reference(x, eps, params):
    w1, b1, wmu, bmu, wlv, blv, w3, b3, w4, b4 = params
    B = x.shape[0]
    xf = x.reshape(B, INPUT_DIM)
    h1 = _leaky_relu(xf @ w1 + b1)
    mu = h1 @ wmu + bmu
    lv = h1 @ wlv + blv
    z = mu + eps * jnp.exp(0.5 * lv)
    h3 = _leaky_relu(z @ w3 + b3)
    recon = jax.nn.sigmoid(h3 @ w4 + b4)
    return recon.reshape(B, 28, 28), mu, lv


if __name__ == "__main__":
    key = jax.random.PRNGKey(0)
    k_param, k_x, k_eps = jax.random.split(key, 3)

    B = 8
    x = jax.random.uniform(k_x, (B, 28, 28), jnp.float32)         # fake MNIST images
    eps = jax.random.normal(k_eps, (B, LATENT_DIM), jnp.float32)  # reparam noise
    params = init_params(k_param)
    packed = pack_params(params)

    recon, mu, log_var = vae_forward(x, eps, packed)
    jax.block_until_ready((recon, mu, log_var))

    r_ref, mu_ref, lv_ref = vae_reference(x, eps, params)

    assert recon.shape == (B, 28, 28)
    assert mu.shape == (B, LATENT_DIM)
    assert log_var.shape == (B, LATENT_DIM)
    assert bool(jnp.all(jnp.isfinite(recon)))
    assert bool(jnp.all((recon >= 0.0) & (recon <= 1.0)))
    # bf16 MXU inputs / bf16 recon writeback -> compare vs f32 reference with tolerance.
    assert bool(jnp.max(jnp.abs(mu - mu_ref)) < 5e-2)
    assert bool(jnp.max(jnp.abs(log_var - lv_ref)) < 5e-2)
    assert bool(jnp.max(jnp.abs(recon - r_ref)) < 5e-2)

    print("KERNEL_OK")
</pallas_src>

<mosaic_0001>
module attributes {stable_mosaic.version = 11 : i64} {
  func.func @vae_kernel(%arg0: i32, %arg1: memref<16x784xbf16, #tpu.memory_space<vmem>>, %arg2: memref<16x128xf32, #tpu.memory_space<vmem>>, %arg3: memref<784x512xbf16, #tpu.memory_space<vmem>>, %arg4: memref<1x512xf32, #tpu.memory_space<vmem>>, %arg5: memref<512x256xbf16, #tpu.memory_space<vmem>>, %arg6: memref<1x256xf32, #tpu.memory_space<vmem>>, %arg7: memref<128x512xbf16, #tpu.memory_space<vmem>>, %arg8: memref<1x512xf32, #tpu.memory_space<vmem>>, %arg9: memref<512x896xbf16, #tpu.memory_space<vmem>>, %arg10: memref<1x896xf32, #tpu.memory_space<vmem>>, %arg11: memref<16x896xbf16, #tpu.memory_space<vmem>>, %arg12: memref<16x256xf32, #tpu.memory_space<vmem>>) attributes {dimension_semantics = [#tpu.dimension_semantics<parallel>], iteration_bounds = array<i64: 1>, scalar_prefetch = 0 : i64, scratch_operands = 0 : i64, tpu.core_type = #tpu.core_type<tc>, window_params = [{transform_indices = @transform_0, window_bounds = array<i64: 16, 784>}, {transform_indices = @transform_1, window_bounds = array<i64: 16, 128>}, {pipeline_mode = #tpu.pipeline_mode<synchronous>, transform_indices = @transform_2, window_bounds = array<i64: 784, 512>}, {pipeline_mode = #tpu.pipeline_mode<synchronous>, transform_indices = @transform_3, window_bounds = array<i64: 1, 512>}, {pipeline_mode = #tpu.pipeline_mode<synchronous>, transform_indices = @transform_4, window_bounds = array<i64: 512, 256>}, {pipeline_mode = #tpu.pipeline_mode<synchronous>, transform_indices = @transform_5, window_bounds = array<i64: 1, 256>}, {pipeline_mode = #tpu.pipeline_mode<synchronous>, transform_indices = @transform_6, window_bounds = array<i64: 128, 512>}, {pipeline_mode = #tpu.pipeline_mode<synchronous>, transform_indices = @transform_7, window_bounds = array<i64: 1, 512>}, {pipeline_mode = #tpu.pipeline_mode<synchronous>, transform_indices = @transform_8, window_bounds = array<i64: 512, 896>}, {pipeline_mode = #tpu.pipeline_mode<synchronous>, transform_indices = @transform_9, window_bounds = array<i64: 1, 896>}, {transform_indices = @transform_10, window_bounds = array<i64: 16, 896>}, {transform_indices = @transform_11, window_bounds = array<i64: 16, 256>}]} {
    %c0 = arith.constant 0 : index
    %c0_0 = arith.constant 0 : index
    %0 = vector.load %arg1[%c0, %c0_0] : memref<16x784xbf16, #tpu.memory_space<vmem>>, vector<16x784xbf16>
    %c0_1 = arith.constant 0 : index
    %c0_2 = arith.constant 0 : index
    %1 = vector.load %arg3[%c0_1, %c0_2] : memref<784x512xbf16, #tpu.memory_space<vmem>>, vector<784x512xbf16>
    %cst = arith.constant dense<0.000000e+00> : vector<16x512xf32>
    %2 = tpu.matmul %0, %1, %cst {dimension_numbers = #tpu.dot_dimension_numbers<[1], [0], [0], [1], [0, 0, 1, 1], [], []>} : vector<16x784xbf16>, vector<784x512xbf16>, vector<16x512xf32> -> vector<16x512xf32>
    %c0_3 = arith.constant 0 : index
    %c0_4 = arith.constant 0 : index
    %3 = vector.load %arg4[%c0_3, %c0_4] : memref<1x512xf32, #tpu.memory_space<vmem>>, vector<1x512xf32>
    %4 = vector.broadcast %3 : vector<1x512xf32> to vector<16x512xf32>
    %5 = arith.addf %2, %4 : vector<16x512xf32>
    %cst_5 = arith.constant 0.000000e+00 : f32
    %6 = vector.broadcast %cst_5 : f32 to vector<16x512xf32>
    %7 = arith.cmpf ogt, %5, %6 : vector<16x512xf32>
    %cst_6 = arith.constant 2.000000e-01 : f32
    %8 = vector.broadcast %cst_6 : f32 to vector<16x512xf32>
    %9 = arith.mulf %8, %5 : vector<16x512xf32>
    %10 = arith.select %7, %5, %9 : vector<16x512xi1>, vector<16x512xf32>
    %11 = arith.truncf %10 : vector<16x512xf32> to vector<16x512xbf16>
    %c0_7 = arith.constant 0 : index
    %c0_8 = arith.constant 0 : index
    %12 = vector.load %arg5[%c0_7, %c0_8] : memref<512x256xbf16, #tpu.memory_space<vmem>>, vector<512x256xbf16>
    %cst_9 = arith.constant dense<0.000000e+00> : vector<16x256xf32>
    %13 = tpu.matmul %11, %12, %cst_9 {dimension_numbers = #tpu.dot_dimension_numbers<[1], [0], [0], [1], [0, 0, 1, 1], [], []>} : vector<16x512xbf16>, vector<512x256xbf16>, vector<16x256xf32> -> vector<16x256xf32>
    %c0_10 = arith.constant 0 : index
    %c0_11 = arith.constant 0 : index
    %14 = vector.load %arg6[%c0_10, %c0_11] : memref<1x256xf32, #tpu.memory_space<vmem>>, vector<1x256xf32>
    %15 = vector.broadcast %14 : vector<1x256xf32> to vector<16x256xf32>
    %16 = arith.addf %13, %15 : vector<16x256xf32>
    %17 = vector.extract_strided_slice %16 {offsets = [0, 0], sizes = [16, 128], strides = [1, 1]} : vector<16x256xf32> to vector<16x128xf32>
    %18 = vector.extract_strided_slice %16 {offsets = [0, 128], sizes = [16, 128], strides = [1, 1]} : vector<16x256xf32> to vector<16x128xf32>
    %cst_12 = arith.constant 5.000000e-01 : f32
    %19 = vector.broadcast %cst_12 : f32 to vector<16x128xf32>
    %20 = arith.mulf %19, %18 : vector<16x128xf32>
    %21 = math.exp %20 : vector<16x128xf32>
    %c0_13 = arith.constant 0 : index
    %c0_14 = arith.constant 0 : index
    %22 = vector.load %arg2[%c0_13, %c0_14] : memref<16x128xf32, #tpu.memory_space<vmem>>, vector<16x128xf32>
    %23 = arith.mulf %22, %21 : vector<16x128xf32>
    %24 = arith.addf %17, %23 : vector<16x128xf32>
    %25 = arith.truncf %24 : vector<16x128xf32> to vector<16x128xbf16>
    %c0_15 = arith.constant 0 : index
    %c0_16 = arith.constant 0 : index
    %26 = vector.load %arg7[%c0_15, %c0_16] : memref<128x512xbf16, #tpu.memory_space<vmem>>, vector<128x512xbf16>
    %cst_17 = arith.constant dense<0.000000e+00> : vector<16x512xf32>
    %27 = tpu.matmul %25, %26, %cst_17 {dimension_numbers = #tpu.dot_dimension_numbers<[1], [0], [0], [1], [0, 0, 1, 1], [], []>} : vector<16x128xbf16>, vector<128x512xbf16>, vector<16x512xf32> -> vector<16x512xf32>
    %c0_18 = arith.constant 0 : index
    %c0_19 = arith.constant 0 : index
    %28 = vector.load %arg8[%c0_18, %c0_19] : memref<1x512xf32, #tpu.memory_space<vmem>>, vector<1x512xf32>
    %29 = vector.broadcast %28 : vector<1x512xf32> to vector<16x512xf32>
    %30 = arith.addf %27, %29 : vector<16x512xf32>
    %cst_20 = arith.constant 0.000000e+00 : f32
    %31 = vector.broadcast %cst_20 : f32 to vector<16x512xf32>
    %32 = arith.cmpf ogt, %30, %31 : vector<16x512xf32>
    %cst_21 = arith.constant 2.000000e-01 : f32
    %33 = vector.broadcast %cst_21 : f32 to vector<16x512xf32>
    %34 = arith.mulf %33, %30 : vector<16x512xf32>
    %35 = arith.select %32, %30, %34 : vector<16x512xi1>, vector<16x512xf32>
    %36 = arith.truncf %35 : vector<16x512xf32> to vector<16x512xbf16>
    %c0_22 = arith.constant 0 : index
    %c0_23 = arith.constant 0 : index
    %37 = vector.load %arg9[%c0_22, %c0_23] : memref<512x896xbf16, #tpu.memory_space<vmem>>, vector<512x896xbf16>
    %cst_24 = arith.constant dense<0.000000e+00> : vector<16x896xf32>
    %38 = tpu.matmul %36, %37, %cst_24 {dimension_numbers = #tpu.dot_dimension_numbers<[1], [0], [0], [1], [0, 0, 1, 1], [], []>} : vector<16x512xbf16>, vector<512x896xbf16>, vector<16x896xf32> -> vector<16x896xf32>
    %c0_25 = arith.constant 0 : index
    %c0_26 = arith.constant 0 : index
    %39 = vector.load %arg10[%c0_25, %c0_26] : memref<1x896xf32, #tpu.memory_space<vmem>>, vector<1x896xf32>
    %40 = vector.broadcast %39 : vector<1x896xf32> to vector<16x896xf32>
    %41 = arith.addf %38, %40 : vector<16x896xf32>
    %cst_27 = arith.constant 0.000000e+00 : f32
    %42 = vector.broadcast %cst_27 : f32 to vector<16x896xf32>
    %43 = arith.subf %42, %41 : vector<16x896xf32>
    %44 = math.exp %43 : vector<16x896xf32>
    %cst_28 = arith.constant 1.000000e+00 : f32
    %45 = vector.broadcast %cst_28 : f32 to vector<16x896xf32>
    %46 = arith.addf %45, %44 : vector<16x896xf32>
    %47 = tpu.reciprocal %46 {approx = true} : vector<16x896xf32> -> vector<16x896xf32>
    %48 = arith.truncf %47 : vector<16x896xf32> to vector<16x896xbf16>
    %c0_29 = arith.constant 0 : index
    %c0_30 = arith.constant 0 : index
    %49 = vector.load %arg11[%c0_29, %c0_30] : memref<16x896xbf16, #tpu.memory_space<vmem>>, vector<16x896xbf16>
    tpu.vector_store %arg11[%c0_29, %c0_30], %48 {strides = array<i32>} : memref<16x896xbf16, #tpu.memory_space<vmem>>, vector<16x896xbf16>,
    %c0_31 = arith.constant 0 : index
    %c0_32 = arith.constant 0 : index
    %50 = vector.load %arg12[%c0_31, %c0_32] : memref<16x256xf32, #tpu.memory_space<vmem>>, vector<16x256xf32>
    tpu.vector_store %arg12[%c0_31, %c0_32], %16 {strides = array<i32>} : memref<16x256xf32, #tpu.memory_space<vmem>>, vector<16x256xf32>,
    return
  }
  func.func @transform_0(%arg0: i32) -> (i32, i32) {
    %c0_i32 = arith.constant 0 : i32
    %c0_i32_0 = arith.constant 0 : i32
    return %arg0, %c0_i32 : i32, i32
  }
  func.func @transform_1(%arg0: i32) -> (i32, i32) {
    %c0_i32 = arith.constant 0 : i32
    %c0_i32_0 = arith.constant 0 : i32
    return %arg0, %c0_i32 : i32, i32
  }
  func.func @transform_2(%arg0: i32) -> (i32, i32) {
    %c0_i32 = arith.constant 0 : i32
    %c0_i32_0 = arith.constant 0 : i32
    %c0_i32_1 = arith.constant 0 : i32
    return %c0_i32, %c0_i32_0 : i32, i32
  }
  func.func @transform_3(%arg0: i32) -> (i32, i32) {
    %c0_i32 = arith.constant 0 : i32
    %c0_i32_0 = arith.constant 0 : i32
    %c0_i32_1 = arith.constant 0 : i32
    return %c0_i32, %c0_i32_0 : i32, i32
  }
  func.func @transform_4(%arg0: i32) -> (i32, i32) {
    %c0_i32 = arith.constant 0 : i32
    %c0_i32_0 = arith.constant 0 : i32
    %c0_i32_1 = arith.constant 0 : i32
    return %c0_i32, %c0_i32_0 : i32, i32
  }
  func.func @transform_5(%arg0: i32) -> (i32, i32) {
    %c0_i32 = arith.constant 0 : i32
    %c0_i32_0 = arith.constant 0 : i32
    %c0_i32_1 = arith.constant 0 : i32
    return %c0_i32, %c0_i32_0 : i32, i32
  }
  func.func @transform_6(%arg0: i32) -> (i32, i32) {
    %c0_i32 = arith.constant 0 : i32
    %c0_i32_0 = arith.constant 0 : i32
    %c0_i32_1 = arith.constant 0 : i32
    return %c0_i32, %c0_i32_0 : i32, i32
  }
  func.func @transform_7(%arg0: i32) -> (i32, i32) {
    %c0_i32 = arith.constant 0 : i32
    %c0_i32_0 = arith.constant 0 : i32
    %c0_i32_1 = arith.constant 0 : i32
    return %c0_i32, %c0_i32_0 : i32, i32
  }
  func.func @transform_8(%arg0: i32) -> (i32, i32) {
    %c0_i32 = arith.constant 0 : i32
    %c0_i32_0 = arith.constant 0 : i32
    %c0_i32_1 = arith.constant 0 : i32
    return %c0_i32, %c0_i32_0 : i32, i32
  }
  func.func @transform_9(%arg0: i32) -> (i32, i32) {
    %c0_i32 = arith.constant 0 : i32
    %c0_i32_0 = arith.constant 0 : i32
    %c0_i32_1 = arith.constant 0 : i32
    return %c0_i32, %c0_i32_0 : i32, i32
  }
  func.func @transform_10(%arg0: i32) -> (i32, i32) {
    %c0_i32 = arith.constant 0 : i32
    %c0_i32_0 = arith.constant 0 : i32
    return %arg0, %c0_i32 : i32, i32
  }
  func.func @transform_11(%arg0: i32) -> (i32, i32) {
    %c0_i32 = arith.constant 0 : i32
    %c0_i32_0 = arith.constant 0 : i32
    return %arg0, %c0_i32 : i32, i32
  }
}

</mosaic_0001>

<bundles_post_ra>
// kernel: vae_forward.1
= control target key start
LH: loop header
LB: loop body
LE: loop exit
PB: predicated region body
PF: predicated region fallthrough
CT: control target
= control target key end

     0   :  { %17 = vsyncpa [#allocation3], 0  ;;  %s6498_s0 = inlined_call_operand.vmem [shape: bf16[16,784], index: 0, kind: input, shape index: {}]   ;;  %s6499_s1 = inlined_call_operand.vmem [shape: f32[16,128], index: 1, kind: input, shape index: {}]   ;;  %s6500_s2 = inlined_call_operand.hbm [shape: bf16[784,512], index: 2, kind: input, shape index: {}]   ;;  %s6501_s3 = inlined_call_operand.vmem [shape: f32[1,512], index: 3, kind: input, shape index: {}]   ;;  %s6502_s4 = inlined_call_operand.vmem [shape: bf16[512,256], index: 4, kind: input, shape index: {}]   ;;  %s6503_s5 = inlined_call_operand.vmem [shape: f32[1,256], index: 5, kind: input, shape index: {}]   ;;  %s6504_s6 = inlined_call_operand.vmem [shape: bf16[128,512], index: 6, kind: input, shape index: {}]   ;;  %s6505_s7 = inlined_call_operand.vmem [shape: f32[1,512], index: 7, kind: input, shape index: {}]   ;;  %s6506_s8 = inlined_call_operand.hbm [shape: bf16[512,896], index: 8, kind: input, shape index: {}]   ;;  %s6507_s9 = inlined_call_operand.vmem [shape: f32[1,896], index: 9, kind: input, shape index: {}]   ;;  %s6508_s10 = inlined_call_operand.vmem [shape: bf16[16,896], index: 10, kind: output, shape index: {0}]   ;;  %s6509_s11 = inlined_call_operand.vmem [shape: f32[16,256], index: 11, kind: output, shape index: {1}]  }
   0x1   :  { %18 = vsyncpa [#allocation5], 0  ;;  %s5959_s17 = smov [#allocation2]   ;;  %s5911_s21 = scalar_lea.hbm %s6500_s2, 25088 }
   0x2   :  { %s28_s18 = sshll.u32 %s5959_s17, 4  ;;  %p5912_p0 = scmp.ne.s32.totalorder %s6500_s2, %s5911_s21  ;;  %s29_s18 = int_to_ptr.vmem [resolvable:$true] %s28_s18 }
   0x3   :  { %p5915_p1 = scmp.lt.u32.totalorder %s5911_s21, %s6500_s2 }
   0x5   :  { %p5917_p2 = pnand %p5915_p1, %p5912_p0 }
   0x7   :  { %5920 = shalt.err (!%p5917_p2)
}
   0x8   :  { %s5921_s26 = scalar_lea.vmem %s29_s18, 25088  ;;  %p5926_p4 = scmp.lt.s32.totalorder %s29_s18, %s29_s18 }
   0x9   :  { %p5922_p3 = scmp.ne.s32.totalorder %s29_s18, %s5921_s26  ;;  %p5927_p5 = scmp.lt.s32.totalorder %s5921_s26, %s5921_s26 }
   0xb   :  { %p5928_p6 = por %p5927_p5, %p5926_p4 }
   0xd   :  { %p5929_p7 = pnand %p5928_p6, %p5922_p3 }
   0xf   :  { %5932 = shalt.err (!%p5929_p7)
}
  0x10   :  { %s5960_s27 = smov 256   ;;  %s5961_s28 = smov 16  }
  0x11   :  { %34 = dma.hbm_to_vmem [thread:$0]  %s6500_s2, 25088, %s29_s18, [#allocation3], %s5960_s27, %s5960_s27, %s5961_s28  }
  0x12   :  { %s5962_s12 = smov [#allocation4]   ;;  %s5933_s16 = scalar_lea.hbm %s6506_s8, 28672 }
  0x13   :  { %s50_s13 = sshll.u32 %s5962_s12, 4  ;;  %p5934_p8 = scmp.ne.s32.totalorder %s6506_s8, %s5933_s16  ;;  %s51_s13 = int_to_ptr.vmem [resolvable:$true] %s50_s13 }
  0x14   :  { %p5937_p9 = scmp.lt.u32.totalorder %s5933_s16, %s6506_s8 }
  0x16   :  { %p5939_p10 = pnand %p5937_p9, %p5934_p8 }
  0x18   :  { %5942 = shalt.err (!%p5939_p10)
}
  0x19   :  { %s5943_s22 = scalar_lea.vmem %s51_s13, 28672  ;;  %p5948_p12 = scmp.lt.s32.totalorder %s51_s13, %s51_s13 }
  0x1a   :  { %p5944_p11 = scmp.ne.s32.totalorder %s51_s13, %s5943_s22  ;;  %p5949_p13 = scmp.lt.s32.totalorder %s5943_s22, %s5943_s22 }
  0x1c   :  { %p5950_p0 = por %p5949_p13, %p5948_p12 }
  0x1e   :  { %p5951_p1 = pnand %p5950_p0, %p5944_p11 }
  0x20   :  { %5954 = shalt.err (!%p5951_p1)
}
  0x21   :  { %s5963_s2 = smov 448   ;;  %s5964_s18 = smov 28  }
  0x22   :  { %56 = dma.hbm_to_vmem [thread:$0]  %s6506_s8, 28672, %s51_s13, [#allocation5], %s5963_s2, %s5963_s2, %s5964_s18  }
  0x23   :  { %5955 = dma.done.wait [#allocation3], 25088  }
  0x24   :  { %5956 = vsyncadd [#allocation3], 4294942208 }
  0x25   :  { %5957 = dma.done.wait [#allocation5], 28672  }
  0x26   :  { %5958 = vsyncadd [#allocation5], 4294938624  ;;  %v5083_v0 = vld [vmem:[#allocation2 + $0x4] ss:$16 sps:$4 sm:$0xff]   ;;  %v5085_v1 = vld [vmem:[#allocation2 + $0xc] ss:$16 sps:$4 sm:$0xff]  }
  0x27   :  { %1311 = vmatprep.subr.bf16.mxu0 %v5083_v0  ;;  %v5087_v2 = vld [vmem:[#allocation2] ss:$16 sps:$4 sm:$0xff]   ;;  %v5088_v3 = vld [vmem:[#allocation2 + $0x8] ss:$16 sps:$4 sm:$0xff]   ;;  %1483 = vmatprep.subr.bf16.mxu1 %v5085_v1  ;;  %v5089_v4 = vld [vmem:[#allocation2 + $0x24] ss:$16 sps:$4 sm:$0xff]  }
  0x28   :  { %1312 = vmatpush1.bf16.msra.mxu0 %v5087_v2  ;;  %1484 = vmatpush1.bf16.msra.mxu1 %v5088_v3  ;;  %v5091_v5 = vld [vmem:[#allocation2 + $0x2c] ss:$16 sps:$4 sm:$0xff]   ;;  %v5093_v6 = vld [vmem:[#allocation2 + $0x20] ss:$16 sps:$4 sm:$0xff]   ;;  %v5094_v7 = vld [vmem:[#allocation2 + $0x28] ss:$16 sps:$4 sm:$0xff]  }
  0x29   :  { %1313 = vmatprep.subr.bf16.mxu0 %v5089_v4  ;;  %1485 = vmatprep.subr.bf16.mxu1 %v5091_v5  ;;  %v5095_v8 = vld [vmem:[#allocation2 + $0x44] ss:$16 sps:$4 sm:$0xff]   ;;  %v5097_v9 = vld [vmem:[#allocation2 + $0x4c] ss:$16 sps:$4 sm:$0xff]   ;;  %v5099_v10 = vld [vmem:[#allocation2 + $0x40] ss:$16 sps:$4 sm:$0xff]  }
  0x2a   :  { %v5100_v11 = vld [vmem:[#allocation2 + $0x48] ss:$16 sps:$4 sm:$0xff]   ;;  %v5101_v12 = vld [vmem:[#allocation2 + $0x64] ss:$16 sps:$4 sm:$0xff]   ;;  %v5103_v13 = vld [vmem:[#allocation2 + $0x6c] ss:$16 sps:$4 sm:$0xff]  }
  0x2b   :  { %v5105_v14 = vld [vmem:[#allocation2 + $0x60] ss:$16 sps:$4 sm:$0xff]   ;;  %v5106_v15 = vld [vmem:[#allocation2 + $0x68] ss:$16 sps:$4 sm:$0xff]   ;;  %v5107_v16 = vld [vmem:[#allocation2 + $0x84] ss:$16 sps:$4 sm:$0xff]  }
  0x2c   :  { %1314 = vmatpush1.bf16.msra.mxu0 %v5093_v6  ;;  %1486 = vmatpush1.bf16.msra.mxu1 %v5094_v7  ;;  %v5109_v17 = vld [vmem:[#allocation2 + $0x8c] ss:$16 sps:$4 sm:$0xff]   ;;  %v5111_v18 = vld [vmem:[#allocation2 + $0x80] ss:$16 sps:$4 sm:$0xff]   ;;  %v5112_v19 = vld [vmem:[#allocation2 + $0x88] ss:$16 sps:$4 sm:$0xff]  }
  0x2d   :  { %1315 = vmatprep.subr.bf16.mxu0 %v5095_v8  ;;  %1487 = vmatprep.subr.bf16.mxu1 %v5097_v9  ;;  %v5113_v20 = vld [vmem:[#allocation2 + $0xa4] ss:$16 sps:$4 sm:$0xff]   ;;  %v5115_v21 = vld [vmem:[#allocation2 + $0xac] ss:$16 sps:$4 sm:$0xff]   ;;  %v5117_v22 = vld [vmem:[#allocation2 + $0xa0] ss:$16 sps:$4 sm:$0xff]  }
  0x2e   :  { %v5118_v23 = vld [vmem:[#allocation2 + $0xa8] ss:$16 sps:$4 sm:$0xff]   ;;  %v5119_v24 = vld [vmem:[#allocation2 + $0xc4] ss:$16 sps:$4 sm:$0xff]   ;;  %v5121_v25 = vld [vmem:[#allocation2 + $0xcc] ss:$16 sps:$4 sm:$0xff]  }
  0x2f   :  { %v5123_v26 = vld [vmem:[#allocation2 + $0xc0] ss:$16 sps:$4 sm:$0xff]   ;;  %v5124_v27 = vld [vmem:[#allocation2 + $0xc8] ss:$16 sps:$4 sm:$0xff]   ;;  %v5125_v28 = vld [vmem:[#allocation2 + $0xe4] ss:$16 sps:$4 sm:$0xff]  }
  0x30   :  { %1316 = vmatpush1.bf16.msra.mxu0 %v5099_v10  ;;  %1488 = vmatpush1.bf16.msra.mxu1 %v5100_v11  ;;  %v5127_v29 = vld [vmem:[#allocation2 + $0xec] ss:$16 sps:$4 sm:$0xff]   ;;  %v5129_v30 = vld [vmem:[#allocation2 + $0xe0] ss:$16 sps:$4 sm:$0xff]   ;;  %v5130_v31 = vld [vmem:[#allocation2 + $0xe8] ss:$16 sps:$4 sm:$0xff]  }
  0x31   :  { %1317 = vmatprep.subr.bf16.mxu0 %v5101_v12  ;;  %1489 = vmatprep.subr.bf16.mxu1 %v5103_v13  ;;  %v5131_v32 = vld [vmem:[#allocation2 + $0x104] ss:$16 sps:$4 sm:$0xff]   ;;  %v5133_v33 = vld [vmem:[#allocation2 + $0x10c] ss:$16 sps:$4 sm:$0xff]   ;;  %v5135_v34 = vld [vmem:[#allocation2 + $0x100] ss:$16 sps:$4 sm:$0xff]  }
  0x32   :  { %v5136_v35 = vld [vmem:[#allocation2 + $0x108] ss:$16 sps:$4 sm:$0xff]   ;;  %v5137_v36 = vld [vmem:[#allocation2 + $0x124] ss:$16 sps:$4 sm:$0xff]   ;;  %v5139_v37 = vld [vmem:[#allocation2 + $0x12c] ss:$16 sps:$4 sm:$0xff]  }
  0x33   :  { %v5141_v38 = vld [vmem:[#allocation2 + $0x120] ss:$16 sps:$4 sm:$0xff]   ;;  %v5142_v39 = vld [vmem:[#allocation2 + $0x128] ss:$16 sps:$4 sm:$0xff]   ;;  %v5143_v40 = vld [vmem:[#allocation2 + $0x144] ss:$16 sps:$4 sm:$0xff]  }
  0x34   :  { %1318 = vmatpush1.bf16.msra.mxu0 %v5105_v14  ;;  %1490 = vmatpush1.bf16.msra.mxu1 %v5106_v15  ;;  %v5145_v41 = vld [vmem:[#allocation2 + $0x14c] ss:$16 sps:$4 sm:$0xff]   ;;  %v5147_v42 = vld [vmem:[#allocation2 + $0x140] ss:$16 sps:$4 sm:$0xff]   ;;  %v5148_v43 = vld [vmem:[#allocation2 + $0x148] ss:$16 sps:$4 sm:$0xff]  }
  0x35   :  { %1319 = vmatprep.subr.bf16.mxu0 %v5107_v16  ;;  %1491 = vmatprep.subr.bf16.mxu1 %v5109_v17  ;;  %v5149_v44 = vld [vmem:[#allocation2 + $0x164] ss:$16 sps:$4 sm:$0xff]   ;;  %v5151_v45 = vld [vmem:[#allocation2 + $0x16c] ss:$16 sps:$4 sm:$0xff]   ;;  %v5153_v46 = vld [vmem:[#allocation2 + $0x160] ss:$16 sps:$4 sm:$0xff]  }
  0x36   :  { %v5154_v47 = vld [vmem:[#allocation2 + $0x168] ss:$16 sps:$4 sm:$0xff]   ;;  %v5181_v48 = vld [vmem:[%s6498_s0 + $0x4] ss:$28 sps:$4 sm:$0xff]   ;;  %v5157_v50 = vld [vmem:[#allocation2 + $0x18c] ss:$16 sps:$4 sm:$0xff]  }
  0x37   :  { %v5155_v49 = vld [vmem:[#allocation2 + $0x184] ss:$16 sps:$4 sm:$0xff]   ;;  %1343 = vmatprep.mubr.bf16.mxu0 %v5181_v48  ;;  %1515 = vmatprep.mubr.bf16.mxu1 %v5181_v48  ;;  %v5159_v51 = vld [vmem:[#allocation2 + $0x180] ss:$16 sps:$4 sm:$0xff]   ;;  %v5160_v52 = vld [vmem:[#allocation2 + $0x188] ss:$16 sps:$4 sm:$0xff]  }
  0x38   :  { %1320 = vmatpush1.bf16.msra.mxu0 %v5111_v18  ;;  %1492 = vmatpush1.bf16.msra.mxu1 %v5112_v19  ;;  %v5161_v53 = vld [vmem:[#allocation2 + $0x1a4] ss:$16 sps:$4 sm:$0xff]   ;;  %v5163_v54 = vld [vmem:[#allocation2 + $0x1ac] ss:$16 sps:$4 sm:$0xff]   ;;  %v5165_v55 = vld [vmem:[#allocation2 + $0x1a0] ss:$16 sps:$4 sm:$0xff]  }
  0x39   :  { %1321 = vmatprep.subr.bf16.mxu0 %v5113_v20  ;;  %1493 = vmatprep.subr.bf16.mxu1 %v5115_v21  ;;  %v5166_v56 = vld [vmem:[#allocation2 + $0x1a8] ss:$16 sps:$4 sm:$0xff]   ;;  %v5167_v57 = vld [vmem:[#allocation2 + $0x1c4] ss:$16 sps:$4 sm:$0xff]   ;;  %v5169_v58 = vld [vmem:[#allocation2 + $0x1cc] ss:$16 sps:$4 sm:$0xff]  }
  0x3a   :  { %v5171_v59 = vld [vmem:[#allocation2 + $0x1c0] ss:$16 sps:$4 sm:$0xff]   ;;  %v5172_v60 = vld [vmem:[#allocation2 + $0x1c8] ss:$16 sps:$4 sm:$0xff]   ;;  %v5173_v61 = vld [vmem:[#allocation2 + $0x1e4] ss:$16 sps:$4 sm:$0xff]  }
  0x3b   :  { %v5175_v62 = vld [vmem:[#allocation2 + $0x1ec] ss:$16 sps:$4 sm:$0xff]   ;;  %v5177_v63 = vld [vmem:[#allocation2 + $0x1e0] ss:$16 sps:$4 sm:$0xff]   ;;  %v5178_v0 = vld [vmem:[#allocation2 + $0x1e8] ss:$16 sps:$4 sm:$0xff]  }
  0x3c   :  { %1322 = vmatpush1.bf16.msra.mxu0 %v5117_v22  ;;  %1494 = vmatpush1.bf16.msra.mxu1 %v5118_v23  ;;  %v5184_v1 = vld [vmem:[#allocation2 + $0x204] ss:$16 sps:$4 sm:$0xff]   ;;  %v5187_v2 = vld [vmem:[#allocation2 + $0x20c] ss:$16 sps:$4 sm:$0xff]   ;;  %v5182_v4 = vld [vmem:[#allocation2 + $0x200] ss:$16 sps:$4 sm:$0xff]  }
  0x3d   :  { %1323 = vmatprep.subr.bf16.mxu0 %v5119_v24  ;;  %1495 = vmatprep.subr.bf16.mxu1 %v5121_v25  ;;  %v5179_v3 = vld [vmem:[%s6498_s0] ss:$28 sps:$4 sm:$0xff]   ;;  %v5185_v5 = vld [vmem:[#allocation2 + $0x208] ss:$16 sps:$4 sm:$0xff]   ;;  %v5190_v6 = vld [vmem:[#allocation2 + $0x224] ss:$16 sps:$4 sm:$0xff]  }
  0x3e   :  { %v5193_v7 = vld [vmem:[#allocation2 + $0x22c] ss:$16 sps:$4 sm:$0xff]   ;;  %v5188_v8 = vld [vmem:[#allocation2 + $0x220] ss:$16 sps:$4 sm:$0xff]   ;;  %v5191_v9 = vld [vmem:[#allocation2 + $0x228] ss:$16 sps:$4 sm:$0xff]  }
  0x3f   :  { %v5196_v10 = vld [vmem:[#allocation2 + $0x244] ss:$16 sps:$4 sm:$0xff]   ;;  %v5199_v11 = vld [vmem:[#allocation2 + $0x24c] ss:$16 sps:$4 sm:$0xff]   ;;  %v5194_v12 = vld [vmem:[#allocation2 + $0x240] ss:$16 sps:$4 sm:$0xff]  }
  0x40   :  { %1324 = vmatpush1.bf16.msra.mxu0 %v5123_v26  ;;  %1496 = vmatpush1.bf16.msra.mxu1 %v5124_v27  ;;  %v5197_v13 = vld [vmem:[#allocation2 + $0x248] ss:$16 sps:$4 sm:$0xff]   ;;  %v5202_v14 = vld [vmem:[#allocation2 + $0x264] ss:$16 sps:$4 sm:$0xff]   ;;  %v5205_v15 = vld [vmem:[#allocation2 + $0x26c] ss:$16 sps:$4 sm:$0xff]  }
  0x41   :  { %1325 = vmatprep.subr.bf16.mxu0 %v5125_v28  ;;  %1497 = vmatprep.subr.bf16.mxu1 %v5127_v29  ;;  %v5200_v16 = vld [vmem:[#allocation2 + $0x260] ss:$16 sps:$4 sm:$0xff]   ;;  %v5203_v17 = vld [vmem:[#allocation2 + $0x268] ss:$16 sps:$4 sm:$0xff]   ;;  %v5208_v18 = vld [vmem:[#allocation2 + $0x284] ss:$16 sps:$4 sm:$0xff]  }
  0x42   :  { %v5211_v19 = vld [vmem:[#allocation2 + $0x28c] ss:$16 sps:$4 sm:$0xff]   ;;  %v5206_v20 = vld [vmem:[#allocation2 + $0x280] ss:$16 sps:$4 sm:$0xff]   ;;  %v5209_v21 = vld [vmem:[#allocation2 + $0x288] ss:$16 sps:$4 sm:$0xff]  }
  0x43   :  { %v5214_v22 = vld [vmem:[#allocation2 + $0x2a4] ss:$16 sps:$4 sm:$0xff]   ;;  %v5217_v23 = vld [vmem:[#allocation2 + $0x2ac] ss:$16 sps:$4 sm:$0xff]   ;;  %v5212_v24 = vld [vmem:[#allocation2 + $0x2a0] ss:$16 sps:$4 sm:$0xff]  }
  0x44   :  { %1326 = vmatpush1.bf16.msra.mxu0 %v5129_v30  ;;  %1498 = vmatpush1.bf16.msra.mxu1 %v5130_v31  ;;  %v5215_v25 = vld [vmem:[#allocation2 + $0x2a8] ss:$16 sps:$4 sm:$0xff]   ;;  %v5220_v26 = vld [vmem:[#allocation2 + $0x2c4] ss:$16 sps:$4 sm:$0xff]   ;;  %v5223_v27 = vld [vmem:[#allocation2 + $0x2cc] ss:$16 sps:$4 sm:$0xff]  }
  0x45   :  { %1327 = vmatprep.subr.bf16.mxu0 %v5131_v32  ;;  %1499 = vmatprep.subr.bf16.mxu1 %v5133_v33  ;;  %v5218_v28 = vld [vmem:[#allocation2 + $0x2c0] ss:$16 sps:$4 sm:$0xff]   ;;  %v5221_v29 = vld [vmem:[#allocation2 + $0x2c8] ss:$16 sps:$4 sm:$0xff]   ;;  %v5226_v31 = vld [vmem:[#allocation2 + $0x2e4] ss:$16 sps:$4 sm:$0xff]  }
  0x46   :  { %v5280_v30 = vld [vmem:[%s6498_s0 + $0xc] ss:$28 sps:$4 sm:$0xff]   ;;  %v5224_v33 = vld [vmem:[#allocation2 + $0x2e0] ss:$16 sps:$4 sm:$0xff]   ;;  %vm1307_vm0 = vcmask 130048  }
  0x47   :  { %v5229_v32 = vld [vmem:[#allocation2 + $0x2ec] ss:$16 sps:$4 sm:$0xff]  }
  0x48   :  { %1328 = vmatpush1.bf16.msra.mxu0 %v5135_v34  ;;  %1500 = vmatpush1.bf16.msra.mxu1 %v5136_v35  ;;  %v5227_v34 = vld [vmem:[#allocation2 + $0x2e8] ss:$16 sps:$4 sm:$0xff]   ;;  %v5232_v35 = vld [vmem:[#allocation2 + $0x304] ss:$16 sps:$4 sm:$0xff]   ;;  %v5253_v48 = vld [vmem:[#allocation2 + $0x36c] ss:$16 sps:$4 sm:$0xff]  }
  0x49   :  { %1329 = vmatprep.subr.bf16.mxu0 %v5137_v36  ;;  %1501 = vmatprep.subr.bf16.mxu1 %v5139_v37  ;;  %v5235_v36 = vld [vmem:[#allocation2 + $0x30c] ss:$16 sps:$4 sm:$0xff]   ;;  %v5230_v37 = vld [vmem:[#allocation2 + $0x300] ss:$16 sps:$4 sm:$0xff]  }
  0x4c   :  { %1330 = vmatpush1.bf16.msra.mxu0 %v5141_v38  ;;  %1502 = vmatpush1.bf16.msra.mxu1 %v5142_v39  ;;  %v5233_v38 = vld [vmem:[#allocation2 + $0x308] ss:$16 sps:$4 sm:$0xff]   ;;  %v5238_v39 = vld [vmem:[#allocation2 + $0x324] ss:$16 sps:$4 sm:$0xff]  }
  0x4d   :  { %1331 = vmatprep.subr.bf16.mxu0 %v5143_v40  ;;  %1503 = vmatprep.subr.bf16.mxu1 %v5145_v41  ;;  %v5241_v40 = vld [vmem:[#allocation2 + $0x32c] ss:$16 sps:$4 sm:$0xff]   ;;  %v5236_v41 = vld [vmem:[#allocation2 + $0x320] ss:$16 sps:$4 sm:$0xff]  }
  0x50   :  { %1332 = vmatpush1.bf16.msra.mxu0 %v5147_v42  ;;  %1504 = vmatpush1.bf16.msra.mxu1 %v5148_v43  ;;  %v5239_v42 = vld [vmem:[#allocation2 + $0x328] ss:$16 sps:$4 sm:$0xff]   ;;  %v5244_v43 = vld [vmem:[#allocation2 + $0x344] ss:$16 sps:$4 sm:$0xff]  }
  0x51   :  { %1333 = vmatprep.subr.bf16.mxu0 %v5149_v44  ;;  %1505 = vmatprep.subr.bf16.mxu1 %v5151_v45  ;;  %v5247_v44 = vld [vmem:[#allocation2 + $0x34c] ss:$16 sps:$4 sm:$0xff]   ;;  %v5242_v45 = vld [vmem:[#allocation2 + $0x340] ss:$16 sps:$4 sm:$0xff]  }
  0x54   :  { %1334 = vmatpush1.bf16.msra.mxu0 %v5153_v46  ;;  %1506 = vmatpush1.bf16.msra.mxu1 %v5154_v47  ;;  %v5245_v46 = vld [vmem:[#allocation2 + $0x348] ss:$16 sps:$4 sm:$0xff]   ;;  %v5250_v47 = vld [vmem:[#allocation2 + $0x364] ss:$16 sps:$4 sm:$0xff]  }
  0x55   :  { %1335 = vmatprep.subr.bf16.mxu0 %v5155_v49  ;;  %1507 = vmatprep.subr.bf16.mxu1 %v5157_v50  ;;  %v5248_v49 = vld [vmem:[#allocation2 + $0x360] ss:$16 sps:$4 sm:$0xff]   ;;  %v5251_v50 = vld [vmem:[#allocation2 + $0x368] ss:$16 sps:$4 sm:$0xff]  }
  0x58   :  { %1336 = vmatpush1.bf16.msra.mxu0 %v5159_v51  ;;  %1508 = vmatpush1.bf16.msra.mxu1 %v5160_v52  ;;  %v5256_v51 = vld [vmem:[#allocation2 + $0x384] ss:$16 sps:$4 sm:$0xff]   ;;  %v5259_v52 = vld [vmem:[#allocation2 + $0x38c] ss:$16 sps:$4 sm:$0xff]  }
  0x59   :  { %1337 = vmatprep.subr.bf16.mxu0 %v5161_v53  ;;  %1509 = vmatprep.subr.bf16.mxu1 %v5163_v54  ;;  %v5254_v53 = vld [vmem:[#allocation2 + $0x380] ss:$16 sps:$4 sm:$0xff]   ;;  %v5257_v54 = vld [vmem:[#allocation2 + $0x388] ss:$16 sps:$4 sm:$0xff]  }
  0x5c   :  { %1338 = vmatpush1.bf16.msra.mxu0 %v5165_v55  ;;  %1510 = vmatpush1.bf16.msra.mxu1 %v5166_v56  ;;  %v5262_v55 = vld [vmem:[#allocation2 + $0x3a4] ss:$16 sps:$4 sm:$0xff]   ;;  %v5265_v56 = vld [vmem:[#allocation2 + $0x3ac] ss:$16 sps:$4 sm:$0xff]  }
  0x5d   :  { %1339 = vmatprep.subr.bf16.mxu0 %v5167_v57  ;;  %1511 = vmatprep.subr.bf16.mxu1 %v5169_v58  ;;  %v5260_v57 = vld [vmem:[#allocation2 + $0x3a0] ss:$16 sps:$4 sm:$0xff]   ;;  %v5263_v58 = vld [vmem:[#allocation2 + $0x3a8] ss:$16 sps:$4 sm:$0xff]  }
  0x60   :  { %1340 = vmatpush1.bf16.msra.mxu0 %v5171_v59  ;;  %1512 = vmatpush1.bf16.msra.mxu1 %v5172_v60  ;;  %v5268_v59 = vld [vmem:[#allocation2 + $0x3c4] ss:$16 sps:$4 sm:$0xff]   ;;  %v5271_v60 = vld [vmem:[#allocation2 + $0x3cc] ss:$16 sps:$4 sm:$0xff]  }
  0x61   :  { %1341 = vmatprep.subr.bf16.mxu0 %v5173_v61  ;;  %1513 = vmatprep.subr.bf16.mxu1 %v5175_v62  ;;  %v5266_v61 = vld [vmem:[#allocation2 + $0x3c0] ss:$16 sps:$4 sm:$0xff]   ;;  %v5269_v62 = vld [vmem:[#allocation2 + $0x3c8] ss:$16 sps:$4 sm:$0xff]  }
  0x64   :  { %1342 = vmatpush1.bf16.msra.mxu0 %v5177_v63  ;;  %1514 = vmatpush1.bf16.msra.mxu1 %v5178_v0  ;;  %v5274_v63 = vld [vmem:[#allocation2 + $0x3e4] ss:$16 sps:$4 sm:$0xff]   ;;  %v5277_v0 = vld [vmem:[#allocation2 + $0x3ec] ss:$16 sps:$4 sm:$0xff]  }
  0x65   :  { %1354 = vmatprep.subr.bf16.mxu0 %v5184_v1  ;;  %1526 = vmatprep.subr.bf16.mxu1 %v5187_v2  ;;  %v5272_v1 = vld [vmem:[#allocation2 + $0x3e0] ss:$16 sps:$4 sm:$0xff]   ;;  %v5275_v2 = vld [vmem:[#allocation2 + $0x3e8] ss:$16 sps:$4 sm:$0xff]  }
  0x67   :  { %1344 = vmatmul.mubr.bf16.vlgmr.msra.gmra.mrb[0].mxu0 %v5179_v3  ;;  %1516 = vmatmul.mubr.bf16.vlgmr.msra.gmra.mrb[0].mxu1 %v5179_v3  ;;  %v5283_v3 = vld [vmem:[#allocation2 + $0x404] ss:$16 sps:$4 sm:$0xff]  }
  0x68   :  { %1355 = vmatpush1.bf16.msra.mxu0 %v5182_v4  ;;  %1527 = vmatpush1.bf16.msra.mxu1 %v5185_v5  ;;  %v5286_v4 = vld [vmem:[#allocation2 + $0x40c] ss:$16 sps:$4 sm:$0xff]   ;;  %v5278_v5 = vld [vmem:[%s6498_s0 + $0x8] ss:$28 sps:$4 sm:$0xff]  }
  0x69   :  { %1356 = vmatprep.subr.bf16.mxu0 %v5190_v6  ;;  %1528 = vmatprep.subr.bf16.mxu1 %v5193_v7  ;;  %v5281_v6 = vld [vmem:[#allocation2 + $0x400] ss:$16 sps:$4 sm:$0xff]   ;;  %v5284_v7 = vld [vmem:[#allocation2 + $0x408] ss:$16 sps:$4 sm:$0xff]  }
  0x6a   :  { %1386 = vmatprep.mubr.bf16.mxu0 %v5280_v30  ;;  %1558 = vmatprep.mubr.bf16.mxu1 %v5280_v30  ;;  %v5322_v30 = vld [vmem:[#allocation2 + $0x4cc] ss:$16 sps:$4 sm:$0xff]  }
  0x6c   :  { %1357 = vmatpush1.bf16.msra.mxu0 %v5188_v8  ;;  %1529 = vmatpush1.bf16.msra.mxu1 %v5191_v9  ;;  %v5289_v8 = vld [vmem:[#allocation2 + $0x424] ss:$16 sps:$4 sm:$0xff]   ;;  %v5292_v9 = vld [vmem:[#allocation2 + $0x42c] ss:$16 sps:$4 sm:$0xff]  }
  0x6d   :  { %1358 = vmatprep.subr.bf16.mxu0 %v5196_v10  ;;  %1530 = vmatprep.subr.bf16.mxu1 %v5199_v11  ;;  %v5287_v10 = vld [vmem:[#allocation2 + $0x420] ss:$16 sps:$4 sm:$0xff]   ;;  %v5290_v11 = vld [vmem:[#allocation2 + $0x428] ss:$16 sps:$4 sm:$0xff]  }
  0x70   :  { %1359 = vmatpush1.bf16.msra.mxu0 %v5194_v12  ;;  %1531 = vmatpush1.bf16.msra.mxu1 %v5197_v13  ;;  %v5379_v12 = vld [vmem:[%s6498_s0 + $0x14] ss:$28 sps:$4 sm:$0xff]  }
  0x71   :  { %1360 = vmatprep.subr.bf16.mxu0 %v5202_v14  ;;  %1532 = vmatprep.subr.bf16.mxu1 %v5205_v15  ;;  %v5295_v13 = vld [vmem:[#allocation2 + $0x444] ss:$16 sps:$4 sm:$0xff]   ;;  %v5298_v14 = vld [vmem:[#allocation2 + $0x44c] ss:$16 sps:$4 sm:$0xff]   ;;  %v5293_v15 = vld [vmem:[#allocation2 + $0x440] ss:$16 sps:$4 sm:$0xff]  }
  0x74   :  { %1361 = vmatpush1.bf16.msra.mxu0 %v5200_v16  ;;  %1533 = vmatpush1.bf16.msra.mxu1 %v5203_v17  ;;  %v5296_v16 = vld [vmem:[#allocation2 + $0x448] ss:$16 sps:$4 sm:$0xff]   ;;  %v5301_v17 = vld [vmem:[#allocation2 + $0x464] ss:$16 sps:$4 sm:$0xff]  }
  0x75   :  { %1362 = vmatprep.subr.bf16.mxu0 %v5208_v18  ;;  %1534 = vmatprep.subr.bf16.mxu1 %v5211_v19  ;;  %v5304_v18 = vld [vmem:[#allocation2 + $0x46c] ss:$16 sps:$4 sm:$0xff]   ;;  %v5299_v19 = vld [vmem:[#allocation2 + $0x460] ss:$16 sps:$4 sm:$0xff]  }
  0x78   :  { %1363 = vmatpush1.bf16.msra.mxu0 %v5206_v20  ;;  %1535 = vmatpush1.bf16.msra.mxu1 %v5209_v21  ;;  %v5302_v20 = vld [vmem:[#allocation2 + $0x468] ss:$16 sps:$4 sm:$0xff]   ;;  %v5307_v21 = vld [vmem:[#allocation2 + $0x484] ss:$16 sps:$4 sm:$0xff]  }
  0x79   :  { %1364 = vmatprep.subr.bf16.mxu0 %v5214_v22  ;;  %1536 = vmatprep.subr.bf16.mxu1 %v5217_v23  ;;  %v5310_v22 = vld [vmem:[#allocation2 + $0x48c] ss:$16 sps:$4 sm:$0xff]   ;;  %v5305_v23 = vld [vmem:[#allocation2 + $0x480] ss:$16 sps:$4 sm:$0xff]  }
  0x7c   :  { %1365 = vmatpush1.bf16.msra.mxu0 %v5212_v24  ;;  %1537 = vmatpush1.bf16.msra.mxu1 %v5215_v25  ;;  %v5308_v24 = vld [vmem:[#allocation2 + $0x488] ss:$16 sps:$4 sm:$0xff]   ;;  %v5313_v25 = vld [vmem:[#allocation2 + $0x4a4] ss:$16 sps:$4 sm:$0xff]  }
  0x7d   :  { %1366 = vmatprep.subr.bf16.mxu0 %v5220_v26  ;;  %1538 = vmatprep.subr.bf16.mxu1 %v5223_v27  ;;  %v5316_v26 = vld [vmem:[#allocation2 + $0x4ac] ss:$16 sps:$4 sm:$0xff]   ;;  %v5311_v27 = vld [vmem:[#allocation2 + $0x4a0] ss:$16 sps:$4 sm:$0xff]  }
  0x80   :  { %1367 = vmatpush1.bf16.msra.mxu0 %v5218_v28  ;;  %1539 = vmatpush1.bf16.msra.mxu1 %v5221_v29  ;;  %v5314_v28 = vld [vmem:[#allocation2 + $0x4a8] ss:$16 sps:$4 sm:$0xff]   ;;  %v5319_v29 = vld [vmem:[#allocation2 + $0x4c4] ss:$16 sps:$4 sm:$0xff]  }
  0x81   :  { %1368 = vmatprep.subr.bf16.mxu0 %v5226_v31  ;;  %1540 = vmatprep.subr.bf16.mxu1 %v5229_v32  ;;  %v5317_v31 = vld [vmem:[#allocation2 + $0x4c0] ss:$16 sps:$4 sm:$0xff]   ;;  %v5320_v32 = vld [vmem:[#allocation2 + $0x4c8] ss:$16 sps:$4 sm:$0xff]  }
  0x84   :  { %1369 = vmatpush1.bf16.msra.mxu0 %v5224_v33  ;;  %1541 = vmatpush1.bf16.msra.mxu1 %v5227_v34  ;;  %v5325_v33 = vld [vmem:[#allocation2 + $0x4e4] ss:$16 sps:$4 sm:$0xff]   ;;  %v5328_v34 = vld [vmem:[#allocation2 + $0x4ec] ss:$16 sps:$4 sm:$0xff]  }
  0x85   :  { %1370 = vmatprep.subr.bf16.mxu0 %v5232_v35  ;;  %1542 = vmatprep.subr.bf16.mxu1 %v5235_v36  ;;  %v5323_v35 = vld [vmem:[#allocation2 + $0x4e0] ss:$16 sps:$4 sm:$0xff]   ;;  %v5326_v36 = vld [vmem:[#allocation2 + $0x4e8] ss:$16 sps:$4 sm:$0xff]  }
  0x88   :  { %1371 = vmatpush1.bf16.msra.mxu0 %v5230_v37  ;;  %1543 = vmatpush1.bf16.msra.mxu1 %v5233_v38  ;;  %v5331_v37 = vld [vmem:[#allocation2 + $0x504] ss:$16 sps:$4 sm:$0xff]   ;;  %v5334_v38 = vld [vmem:[#allocation2 + $0x50c] ss:$16 sps:$4 sm:$0xff]  }
  0x89   :  { %1372 = vmatprep.subr.bf16.mxu0 %v5238_v39  ;;  %1544 = vmatprep.subr.bf16.mxu1 %v5241_v40  ;;  %v5329_v39 = vld [vmem:[#allocation2 + $0x500] ss:$16 sps:$4 sm:$0xff]   ;;  %v5332_v40 = vld [vmem:[#allocation2 + $0x508] ss:$16 sps:$4 sm:$0xff]  }
  0x8c   :  { %1373 = vmatpush1.bf16.msra.mxu0 %v5236_v41  ;;  %1545 = vmatpush1.bf16.msra.mxu1 %v5239_v42  ;;  %v5337_v41 = vld [vmem:[#allocation2 + $0x524] ss:$16 sps:$4 sm:$0xff]   ;;  %v5340_v42 = vld [vmem:[#allocation2 + $0x52c] ss:$16 sps:$4 sm:$0xff]  }
  0x8d   :  { %1374 = vmatprep.subr.bf16.mxu0 %v5244_v43  ;;  %1546 = vmatprep.subr.bf16.mxu1 %v5247_v44  ;;  %v5335_v43 = vld [vmem:[#allocation2 + $0x520] ss:$16 sps:$4 sm:$0xff]   ;;  %v5338_v44 = vld [vmem:[#allocation2 + $0x528] ss:$16 sps:$4 sm:$0xff]  }
  0x90   :  { %1375 = vmatpush1.bf16.msra.mxu0 %v5242_v45  ;;  %1547 = vmatpush1.bf16.msra.mxu1 %v5245_v46  ;;  %v5343_v45 = vld [vmem:[#allocation2 + $0x544] ss:$16 sps:$4 sm:$0xff]   ;;  %v5346_v46 = vld [vmem:[#allocation2 + $0x54c] ss:$16 sps:$4 sm:$0xff]  }
  0x91   :  { %1376 = vmatprep.subr.bf16.mxu0 %v5250_v47  ;;  %1548 = vmatprep.subr.bf16.mxu1 %v5253_v48  ;;  %v5341_v47 = vld [vmem:[#allocation2 + $0x540] ss:$16 sps:$4 sm:$0xff]   ;;  %v5344_v48 = vld [vmem:[#allocation2 + $0x548] ss:$16 sps:$4 sm:$0xff]  }
  0x94   :  { %1377 = vmatpush1.bf16.msra.mxu0 %v5248_v49  ;;  %1549 = vmatpush1.bf16.msra.mxu1 %v5251_v50  ;;  %v5349_v49 = vld [vmem:[#allocation2 + $0x564] ss:$16 sps:$4 sm:$0xff]   ;;  %v5352_v50 = vld [vmem:[#allocation2 + $0x56c] ss:$16 sps:$4 sm:$0xff]  }
  0x95   :  { %1378 = vmatprep.subr.bf16.mxu0 %v5256_v51  ;;  %1550 = vmatprep.subr.bf16.mxu1 %v5259_v52  ;;  %v5347_v51 = vld [vmem:[#allocation2 + $0x560] ss:$16 sps:$4 sm:$0xff]   ;;  %v5350_v52 = vld [vmem:[#allocation2 + $0x568] ss:$16 sps:$4 sm:$0xff]  }
  0x98   :  { %1379 = vmatpush1.bf16.msra.mxu0 %v5254_v53  ;;  %1551 = vmatpush1.bf16.msra.mxu1 %v5257_v54  ;;  %v5355_v53 = vld [vmem:[#allocation2 + $0x584] ss:$16 sps:$4 sm:$0xff]   ;;  %v5358_v54 = vld [vmem:[#allocation2 + $0x58c] ss:$16 sps:$4 sm:$0xff]  }
  0x99   :  { %1380 = vmatprep.subr.bf16.mxu0 %v5262_v55  ;;  %1552 = vmatprep.subr.bf16.mxu1 %v5265_v56  ;;  %v5353_v55 = vld [vmem:[#allocation2 + $0x580] ss:$16 sps:$4 sm:$0xff]   ;;  %v5356_v56 = vld [vmem:[#allocation2 + $0x588] ss:$16 sps:$4 sm:$0xff]  }
  0x9c   :  { %1381 = vmatpush1.bf16.msra.mxu0 %v5260_v57  ;;  %1553 = vmatpush1.bf16.msra.mxu1 %v5263_v58  ;;  %v5361_v57 = vld [vmem:[#allocation2 + $0x5a4] ss:$16 sps:$4 sm:$0xff]   ;;  %v5364_v58 = vld [vmem:[#allocation2 + $0x5ac] ss:$16 sps:$4 sm:$0xff]  }
  0x9d   :  { %1382 = vmatprep.subr.bf16.mxu0 %v5268_v59  ;;  %1554 = vmatprep.subr.bf16.mxu1 %v5271_v60  ;;  %v5359_v59 = vld [vmem:[#allocation2 + $0x5a0] ss:$16 sps:$4 sm:$0xff]   ;;  %v5362_v60 = vld [vmem:[#allocation2 + $0x5a8] ss:$16 sps:$4 sm:$0xff]  }
  0xa0   :  { %1383 = vmatpush1.bf16.msra.mxu0 %v5266_v61  ;;  %1555 = vmatpush1.bf16.msra.mxu1 %v5269_v62  ;;  %v5367_v61 = vld [vmem:[#allocation2 + $0x5c4] ss:$16 sps:$4 sm:$0xff]   ;;  %v5370_v62 = vld [vmem:[#allocation2 + $0x5cc] ss:$16 sps:$4 sm:$0xff]  }
  0xa1   :  { %1384 = vmatprep.subr.bf16.mxu0 %v5274_v63  ;;  %1556 = vmatprep.subr.bf16.mxu1 %v5277_v0  ;;  %v5365_v63 = vld [vmem:[#allocation2 + $0x5c0] ss:$16 sps:$4 sm:$0xff]   ;;  %v5368_v0 = vld [vmem:[#allocation2 + $0x5c8] ss:$16 sps:$4 sm:$0xff]  }
  0xa4   :  { %1385 = vmatpush1.bf16.msra.mxu0 %v5272_v1  ;;  %1557 = vmatpush1.bf16.msra.mxu1 %v5275_v2  ;;  %v5373_v1 = vld [vmem:[#allocation2 + $0x5e4] ss:$16 sps:$4 sm:$0xff]   ;;  %v5376_v2 = vld [vmem:[#allocation2 + $0x5ec] ss:$16 sps:$4 sm:$0xff]  }
  0xa5   :  { %1397 = vmatprep.subr.bf16.mxu0 %v5283_v3  ;;  %1569 = vmatprep.subr.bf16.mxu1 %v5286_v4  ;;  %v5371_v3 = vld [vmem:[#allocation2 + $0x5e0] ss:$16 sps:$4 sm:$0xff]   ;;  %v5374_v4 = vld [vmem:[#allocation2 + $0x5e8] ss:$16 sps:$4 sm:$0xff]  }
  0xa7   :  { %1387 = vmatmul.mubr.bf16.vlgmr.msra.gmra.mrb[0].mxu0 %v5278_v5  ;;  %1559 = vmatmul.mubr.bf16.vlgmr.msra.gmra.mrb[0].mxu1 %v5278_v5  ;;  %v5382_v5 = vld [vmem:[#allocation2 + $0x604] ss:$16 sps:$4 sm:$0xff]  }
  0xa8   :  { %1398 = vmatpush1.bf16.msra.mxu0 %v5281_v6  ;;  %1570 = vmatpush1.bf16.msra.mxu1 %v5284_v7  ;;  %v5385_v6 = vld [vmem:[#allocation2 + $0x60c] ss:$16 sps:$4 sm:$0xff]  }
  0xa9   :  { %1399 = vmatprep.subr.bf16.mxu0 %v5289_v8  ;;  %1571 = vmatprep.subr.bf16.mxu1 %v5292_v9  ;;  %v5377_v7 = vld [vmem:[%s6498_s0 + $0x10] ss:$28 sps:$4 sm:$0xff]   ;;  %v5383_v9 = vld [vmem:[#allocation2 + $0x608] ss:$16 sps:$4 sm:$0xff]  }
  0xaa   :  { %1429 = vmatprep.mubr.bf16.mxu0 %v5379_v12  ;;  %1601 = vmatprep.mubr.bf16.mxu1 %v5379_v12  ;;  %v5380_v8 = vld [vmem:[#allocation2 + $0x600] ss:$16 sps:$4 sm:$0xff]   ;;  %v5386_v12 = vld [vmem:[%s6498_s0 + $0x18] ss:$28 sps:$4 sm:$0xff]  }
  0xac   :  { %1400 = vmatpush1.bf16.msra.mxu0 %v5287_v10  ;;  %1572 = vmatpush1.bf16.msra.mxu1 %v5290_v11  ;;  %v5389_v10 = vld [vmem:[%s6502_s4 + $0x4] ss:$8 sps:$4 sm:$0xff]   ;;  %v5965_v11 = vmov 0  }
  0xad   :  { %1401 = vmatprep.subr.bf16.mxu0 %v5295_v13  ;;  %1573 = vmatprep.subr.bf16.mxu1 %v5298_v14  ;;  %v5387_v13 = vld [vmem:[%s6502_s4] ss:$8 sps:$4 sm:$0xff]   ;;  %v5392_v14 = vld [vmem:[%s6502_s4 + $0x14] ss:$8 sps:$4 sm:$0xff]  }
  0xb0   :  { %1402 = vmatpush1.bf16.msra.mxu0 %v5293_v15  ;;  %1574 = vmatpush1.bf16.msra.mxu1 %v5296_v16  ;;  %v5390_v15 = vld [vmem:[%s6502_s4 + $0x10] ss:$8 sps:$4 sm:$0xff]   ;;  %v5395_v16 = vld [vmem:[%s6502_s4 + $0x24] ss:$8 sps:$4 sm:$0xff]  }
  0xb1   :  { %1403 = vmatprep.subr.bf16.mxu0 %v5301_v17  ;;  %1575 = vmatprep.subr.bf16.mxu1 %v5304_v18  ;;  %v5393_v17 = vld [vmem:[%s6502_s4 + $0x20] ss:$8 sps:$4 sm:$0xff]   ;;  %v5398_v18 = vld [vmem:[%s6502_s4 + $0x34] ss:$8 sps:$4 sm:$0xff]  }
  0xb4   :  { %1404 = vmatpush1.bf16.msra.mxu0 %v5299_v19  ;;  %1576 = vmatpush1.bf16.msra.mxu1 %v5302_v20  ;;  %v5396_v19 = vld [vmem:[%s6502_s4 + $0x30] ss:$8 sps:$4 sm:$0xff]   ;;  %v5401_v20 = vld [vmem:[%s6502_s4 + $0x44] ss:$8 sps:$4 sm:$0xff]  }
  0xb5   :  { %1405 = vmatprep.subr.bf16.mxu0 %v5307_v21  ;;  %1577 = vmatprep.subr.bf16.mxu1 %v5310_v22  ;;  %v5399_v21 = vld [vmem:[%s6502_s4 + $0x40] ss:$8 sps:$4 sm:$0xff]   ;;  %v5404_v22 = vld [vmem:[%s6502_s4 + $0x54] ss:$8 sps:$4 sm:$0xff]  }
  0xb8   :  { %1406 = vmatpush1.bf16.msra.mxu0 %v5305_v23  ;;  %1578 = vmatpush1.bf16.msra.mxu1 %v5308_v24  ;;  %v5402_v23 = vld [vmem:[%s6502_s4 + $0x50] ss:$8 sps:$4 sm:$0xff]   ;;  %v5407_v24 = vld [vmem:[%s6502_s4 + $0x64] ss:$8 sps:$4 sm:$0xff]  }
  0xb9   :  { %1407 = vmatprep.subr.bf16.mxu0 %v5313_v25  ;;  %1579 = vmatprep.subr.bf16.mxu1 %v5316_v26  ;;  %v5405_v25 = vld [vmem:[%s6502_s4 + $0x60] ss:$8 sps:$4 sm:$0xff]   ;;  %v5410_v26 = vld [vmem:[%s6502_s4 + $0x74] ss:$8 sps:$4 sm:$0xff]  }
  0xbc   :  { %1408 = vmatpush1.bf16.msra.mxu0 %v5311_v27  ;;  %1580 = vmatpush1.bf16.msra.mxu1 %v5314_v28  ;;  %v5408_v27 = vld [vmem:[%s6502_s4 + $0x70] ss:$8 sps:$4 sm:$0xff]   ;;  %v5413_v28 = vld [vmem:[%s6502_s4 + $0x84] ss:$8 sps:$4 sm:$0xff]  }
  0xbd   :  { %1409 = vmatprep.subr.bf16.mxu0 %v5319_v29  ;;  %1581 = vmatprep.subr.bf16.mxu1 %v5322_v30  ;;  %v5411_v29 = vld [vmem:[%s6502_s4 + $0x80] ss:$8 sps:$4 sm:$0xff]   ;;  %v5416_v30 = vld [vmem:[%s6502_s4 + $0x94] ss:$8 sps:$4 sm:$0xff]  }
  0xc0   :  { %1410 = vmatpush1.bf16.msra.mxu0 %v5317_v31  ;;  %1582 = vmatpush1.bf16.msra.mxu1 %v5320_v32  ;;  %v5414_v31 = vld [vmem:[%s6502_s4 + $0x90] ss:$8 sps:$4 sm:$0xff]   ;;  %v5419_v32 = vld [vmem:[%s6502_s4 + $0xa4] ss:$8 sps:$4 sm:$0xff]  }
  0xc1   :  { %1411 = vmatprep.subr.bf16.mxu0 %v5325_v33  ;;  %1583 = vmatprep.subr.bf16.mxu1 %v5328_v34  ;;  %v5417_v33 = vld [vmem:[%s6502_s4 + $0xa0] ss:$8 sps:$4 sm:$0xff]   ;;  %v5422_v34 = vld [vmem:[%s6502_s4 + $0xb4] ss:$8 sps:$4 sm:$0xff]  }
  0xc4   :  { %1412 = vmatpush1.bf16.msra.mxu0 %v5323_v35  ;;  %1584 = vmatpush1.bf16.msra.mxu1 %v5326_v36  ;;  %v5420_v35 = vld [vmem:[%s6502_s4 + $0xb0] ss:$8 sps:$4 sm:$0xff]   ;;  %v5425_v36 = vld [vmem:[%s6502_s4 + $0xc4] ss:$8 sps:$4 sm:$0xff]  }
  0xc5   :  { %1413 = vmatprep.subr.bf16.mxu0 %v5331_v37  ;;  %1585 = vmatprep.subr.bf16.mxu1 %v5334_v38  ;;  %v5423_v37 = vld [vmem:[%s6502_s4 + $0xc0] ss:$8 sps:$4 sm:$0xff]   ;;  %v5428_v38 = vld [vmem:[%s6502_s4 + $0xd4] ss:$8 sps:$4 sm:$0xff]  }
  0xc8   :  { %1414 = vmatpush1.bf16.msra.mxu0 %v5329_v39  ;;  %1586 = vmatpush1.bf16.msra.mxu1 %v5332_v40  ;;  %v5426_v39 = vld [vmem:[%s6502_s4 + $0xd0] ss:$8 sps:$4 sm:$0xff]   ;;  %v5431_v40 = vld [vmem:[%s6502_s4 + $0xe4] ss:$8 sps:$4 sm:$0xff]  }
  0xc9   :  { %1415 = vmatprep.subr.bf16.mxu0 %v5337_v41  ;;  %1587 = vmatprep.subr.bf16.mxu1 %v5340_v42  ;;  %v5429_v41 = vld [vmem:[%s6502_s4 + $0xe0] ss:$8 sps:$4 sm:$0xff]   ;;  %v5434_v42 = vld [vmem:[%s6502_s4 + $0xf4] ss:$8 sps:$4 sm:$0xff]  }
  0xcc   :  { %1416 = vmatpush1.bf16.msra.mxu0 %v5335_v43  ;;  %1588 = vmatpush1.bf16.msra.mxu1 %v5338_v44  ;;  %v5432_v43 = vld [vmem:[%s6502_s4 + $0xf0] ss:$8 sps:$4 sm:$0xff]   ;;  %v5437_v44 = vld [vmem:[%s6502_s4 + $0x104] ss:$8 sps:$4 sm:$0xff]  }
  0xcd   :  { %1417 = vmatprep.subr.bf16.mxu0 %v5343_v45  ;;  %1589 = vmatprep.subr.bf16.mxu1 %v5346_v46  ;;  %v5483_v45 = vld [vmem:[%s6504_s6] ss:$16 sps:$4 sm:$0xff]   ;;  %v5485_v46 = vld [vmem:[%s6504_s6 + $0x4] ss:$16 sps:$4 sm:$0xff]  }
  0xd0   :  { %1418 = vmatpush1.bf16.msra.mxu0 %v5341_v47  ;;  %1590 = vmatpush1.bf16.msra.mxu1 %v5344_v48  ;;  %v5488_v47 = vld [vmem:[%s6504_s6 + $0x24] ss:$16 sps:$4 sm:$0xff]   ;;  %v5486_v48 = vld [vmem:[%s6504_s6 + $0x20] ss:$16 sps:$4 sm:$0xff]  }
  0xd1   :  { %1419 = vmatprep.subr.bf16.mxu0 %v5349_v49  ;;  %1591 = vmatprep.subr.bf16.mxu1 %v5352_v50  ;;  %v272_v49 = vlaneseq }
  0xd3   :  { %v6185_v50 = vshrl.u32 %v272_v49, 7  ;;  %v5459_v49 = vld [vmem:[%s6502_s4 + $0x180] ss:$8 sps:$4 sm:$0xff]  }
  0xd4   :  { %1420 = vmatpush1.bf16.msra.mxu0 %v5347_v51  ;;  %1592 = vmatpush1.bf16.msra.mxu1 %v5350_v52 }
  0xd5   :  { %1421 = vmatprep.subr.bf16.mxu0 %v5355_v53  ;;  %1593 = vmatprep.subr.bf16.mxu1 %v5358_v54  ;;  %v6188_v51 = vsub.s32 0, %v6185_v50  ;;  %v6191_v52 = vsub.s32 2, %v6185_v50  ;;  %v270_v53 = vld [vmem:[%s6501_s3] sm:$0xf]  ;;  %v6197_v54 = vsub.s32 1, %v6185_v50 }
  0xd8   :  { %1422 = vmatpush1.bf16.msra.mxu0 %v5353_v55  ;;  %1594 = vmatpush1.bf16.msra.mxu1 %v5356_v56  ;;  %v6200_v55 = vsub.s32 3, %v6185_v50  ;;  %v275_v56 = vrot.slane %v270_v53, %v6188_v51 }
  0xd9   :  { %1423 = vmatprep.subr.bf16.mxu0 %v5361_v57  ;;  %1595 = vmatprep.subr.bf16.mxu1 %v5364_v58  ;;  %v283_v57 = vrot.slane %v270_v53, %v6191_v52  ;;  %v279_v58 = vrot.slane %v270_v53, %v6197_v54 }
  0xdc   :  { %1424 = vmatpush1.bf16.msra.mxu0 %v5359_v59  ;;  %1596 = vmatpush1.bf16.msra.mxu1 %v5362_v60  ;;  %v287_v59 = vrot.slane %v270_v53, %v6200_v55  ;;  %v5464_v53 = vld [vmem:[%s6502_s4 + $0x194] ss:$8 sps:$4 sm:$0xff]  }
  0xdd   :  { %1425 = vmatprep.subr.bf16.mxu0 %v5367_v61  ;;  %1597 = vmatprep.subr.bf16.mxu1 %v5370_v62 }
  0xe0   :  { %1426 = vmatpush1.bf16.msra.mxu0 %v5365_v63  ;;  %1598 = vmatpush1.bf16.msra.mxu1 %v5368_v0 }
  0xe1   :  { %1427 = vmatprep.subr.bf16.mxu0 %v5373_v1  ;;  %1599 = vmatprep.subr.bf16.mxu1 %v5376_v2 }
  0xe4   :  { %1428 = vmatpush1.bf16.msra.mxu0 %v5371_v3  ;;  %1600 = vmatpush1.bf16.msra.mxu1 %v5374_v4 }
  0xe5   :  { %1440 = vmatprep.subr.bf16.mxu0 %v5382_v5  ;;  %1612 = vmatprep.subr.bf16.mxu1 %v5385_v6 }
  0xe7   :  { %1430 = vmatmul.mubr.bf16.vlgmr.msra.gmra.mrb[0].mxu0 %v5377_v7  ;;  %1602 = vmatmul.mubr.bf16.vlgmr.msra.gmra.mrb[0].mxu1 %v5377_v7 }
  0xe8   :  { %1441 = vmatpush1.bf16.msra.mxu0 %v5380_v8  ;;  %1613 = vmatpush1.bf16.msra.mxu1 %v5383_v9 }
  0xe9   :  { %1472 = vmatprep.mubr.bf16.mxu0 %v5965_v11  ;;  %1644 = vmatprep.mubr.bf16.mxu1 %v5965_v11 }
  0xea   :  { %2079 = vmatprep.subr.bf16.mxu0 %v5389_v10  ;;  %2392 = vmatprep.subr.bf16.mxu1 %v5485_v46  ;;  %v5458_v46 = vld [vmem:[%s6502_s4 + $0x174] ss:$8 sps:$4 sm:$0xff]  }
  0xf3   :  { %4630 = vmatmul.mubr.msk.bf16.vlgmr.msra.gmra.mrb[0].mxu0 %vm1307_vm0, %v5386_v12  ;;  %4631 = vmatmul.mubr.msk.bf16.vlgmr.msra.gmra.mrb[0].mxu1 %vm1307_vm0, %v5386_v12 }
  0xf4   :  { %2080 = vmatpush1.bf16.msra.mxu0 %v5387_v13  ;;  %2424 = vmatprep.mubr.bf16.mxu1 %v5965_v11 }
  0xf5   :  { %2081 = vmatprep.subr.bf16.mxu0 %v5392_v14  ;;  %2393 = vmatpush1.bf16.msra.mxu1 %v5483_v45  ;;  %v5453_v45 = vld [vmem:[%s6502_s4 + $0x160] ss:$8 sps:$4 sm:$0xff]  }
  0xf6   :  { %2394 = vmatprep.subr.bf16.mxu1 %v5488_v47  ;;  %v5456_v47 = vld [vmem:[%s6502_s4 + $0x170] ss:$8 sps:$4 sm:$0xff]  }
  0xf8   :  { %2082 = vmatpush1.bf16.msra.mxu0 %v5390_v15 }
  0xf9   :  { %2083 = vmatprep.subr.bf16.mxu0 %v5395_v16  ;;  %2395 = vmatpush1.bf16.msra.mxu1 %v5486_v48  ;;  %v5461_v48 = vld [vmem:[%s6502_s4 + $0x184] ss:$8 sps:$4 sm:$0xff]  }
  0xfc   :  { %2084 = vmatpush1.bf16.msra.mxu0 %v5393_v17 }
  0xfd   :  { %2085 = vmatprep.subr.bf16.mxu0 %v5398_v18 }
 0x100   :  { %2086 = vmatpush1.bf16.msra.mxu0 %v5396_v19 }
 0x101   :  { %2087 = vmatprep.subr.bf16.mxu0 %v5401_v20 }
 0x104   :  { %2088 = vmatpush1.bf16.msra.mxu0 %v5399_v21 }
 0x105   :  { %2089 = vmatprep.subr.bf16.mxu0 %v5404_v22 }
 0x108   :  { %2090 = vmatpush1.bf16.msra.mxu0 %v5402_v23 }
 0x109   :  { %2091 = vmatprep.subr.bf16.mxu0 %v5407_v24 }
 0x10c   :  { %2092 = vmatpush1.bf16.msra.mxu0 %v5405_v25 }
 0x10d   :  { %2093 = vmatprep.subr.bf16.mxu0 %v5410_v26 }
 0x110   :  { %2094 = vmatpush1.bf16.msra.mxu0 %v5408_v27 }
 0x111   :  { %2095 = vmatprep.subr.bf16.mxu0 %v5413_v28 }
 0x114   :  { %2096 = vmatpush1.bf16.msra.mxu0 %v5411_v29 }
 0x115   :  { %2097 = vmatprep.subr.bf16.mxu0 %v5416_v30 }
 0x118   :  { %2098 = vmatpush1.bf16.msra.mxu0 %v5414_v31 }
 0x119   :  { %2099 = vmatprep.subr.bf16.mxu0 %v5419_v32  ;;  %v5435_v32 = vld [vmem:[%s6502_s4 + $0x100] ss:$8 sps:$4 sm:$0xff]  }
 0x11c   :  { %2100 = vmatpush1.bf16.msra.mxu0 %v5417_v33 }
 0x11d   :  { %2101 = vmatprep.subr.bf16.mxu0 %v5422_v34  ;;  %v5440_v34 = vld [vmem:[%s6502_s4 + $0x114] ss:$8 sps:$4 sm:$0xff]  }
 0x120   :  { %2102 = vmatpush1.bf16.msra.mxu0 %v5420_v35  ;;  %v5438_v35 = vld [vmem:[%s6502_s4 + $0x110] ss:$8 sps:$4 sm:$0xff]  }
 0x121   :  { %2103 = vmatprep.subr.bf16.mxu0 %v5425_v36  ;;  %v5443_v36 = vld [vmem:[%s6502_s4 + $0x124] ss:$8 sps:$4 sm:$0xff]  }
 0x124   :  { %2104 = vmatpush1.bf16.msra.mxu0 %v5423_v37  ;;  %v5441_v37 = vld [vmem:[%s6502_s4 + $0x120] ss:$8 sps:$4 sm:$0xff]  }
 0x125   :  { %2105 = vmatprep.subr.bf16.mxu0 %v5428_v38  ;;  %v5446_v38 = vld [vmem:[%s6502_s4 + $0x134] ss:$8 sps:$4 sm:$0xff]  }
 0x128   :  { %2106 = vmatpush1.bf16.msra.mxu0 %v5426_v39  ;;  %v5444_v39 = vld [vmem:[%s6502_s4 + $0x130] ss:$8 sps:$4 sm:$0xff]  }
 0x129   :  { %2107 = vmatprep.subr.bf16.mxu0 %v5431_v40  ;;  %v5449_v40 = vld [vmem:[%s6502_s4 + $0x144] ss:$8 sps:$4 sm:$0xff]  }
 0x12c   :  { %2108 = vmatpush1.bf16.msra.mxu0 %v5429_v41  ;;  %v5447_v41 = vld [vmem:[%s6502_s4 + $0x140] ss:$8 sps:$4 sm:$0xff]  }
 0x12d   :  { %2109 = vmatprep.subr.bf16.mxu0 %v5434_v42  ;;  %v5452_v42 = vld [vmem:[%s6502_s4 + $0x154] ss:$8 sps:$4 sm:$0xff]  }
 0x130   :  { %2110 = vmatpush1.bf16.msra.mxu0 %v5432_v43  ;;  %v5450_v43 = vld [vmem:[%s6502_s4 + $0x150] ss:$8 sps:$4 sm:$0xff]  }
 0x131   :  { %2122 = vmatprep.subr.bf16.mxu0 %v5437_v44  ;;  %v5455_v44 = vld [vmem:[%s6502_s4 + $0x164] ss:$8 sps:$4 sm:$0xff]  }
 0x1c6   :  { %v1474_v60 = vpop.f32.mrb[0].mxu0  ;;  %v1646_v61 = vpop.f32.mrb[0].mxu1 }
 0x1c7   :  { %v5012_v62 = vadd.f32 %v1474_v60, %v275_v56  ;;  %v5016_v63 = vadd.f32 %v1646_v61, %v283_v57  ;;  %v1476_v0 = vpop.f32.mrb[1].mxu0  ;;  %v1648_v1 = vpop.f32.mrb[1].mxu1  ;;  %v5468_v60 = vld [vmem:[%s6502_s4 + $0x1b0] ss:$8 sps:$4 sm:$0xff]   ;;  %v5473_v61 = vld [vmem:[%s6502_s4 + $0x1c4] ss:$8 sps:$4 sm:$0xff]  }
 0x1c8   :  { %v5013_v2 = vadd.f32 %v1476_v0, %v279_v58  ;;  %v5017_v3 = vadd.f32 %v1648_v1, %v287_v59  ;;  %v1478_v4 = vpop.f32.mrb[2].mxu0  ;;  %v1650_v5 = vpop.f32.mrb[2].mxu1  ;;  %v5474_v0 = vld [vmem:[%s6502_s4 + $0x1d0] ss:$8 sps:$4 sm:$0xff]   ;;  %v5479_v1 = vld [vmem:[%s6502_s4 + $0x1e4] ss:$8 sps:$4 sm:$0xff]  }
 0x1c9   :  { %vm1655_vm1 = vcmp.gt.f32.partialorder %v5012_v62, 0.0  ;;  %v1663_v6 = vmul.f32 0.2, %v5012_v62  ;;  %vm1657_vm2 = vcmp.gt.f32.partialorder %v5016_v63, 0.0  ;;  %v1665_v7 = vmul.f32 0.2, %v5016_v63 }
 0x1ca   :  { %vm1656_vm3 = vcmp.gt.f32.partialorder %v5013_v2, 0.0  ;;  %v1664_v8 = vmul.f32 0.2, %v5013_v2  ;;  %vm1658_vm4 = vcmp.gt.f32.partialorder %v5017_v3, 0.0  ;;  %v1666_v9 = vmul.f32 0.2, %v5017_v3 }
 0x1cb   :  { %v5014_v10 = vadd.f32 %v1478_v4, %v275_v56  ;;  %v5018_v12 = vadd.f32 %v1650_v5, %v283_v57  ;;  %v1480_v13 = vpop.f32.mrb[3].mxu0  ;;  %v1652_v14 = vpop.f32.mrb[3].mxu1  ;;  %v1671_v15 = vsel %vm1655_vm1, %v5012_v62, %v1663_v6  ;;  %v6206_v16 = vsel %vm1657_vm2, %v5016_v63, %v1665_v7  ;;  %v5462_v56 = vld [vmem:[%s6502_s4 + $0x190] ss:$8 sps:$4 sm:$0xff]   ;;  %v5467_v57 = vld [vmem:[%s6502_s4 + $0x1a4] ss:$8 sps:$4 sm:$0xff]  }
 0x1cc   :  { %v5015_v17 = vadd.f32 %v1480_v13, %v279_v58  ;;  %v5019_v18 = vadd.f32 %v1652_v14, %v287_v59  ;;  %v1672_v25 = vsel %vm1656_vm3, %v5013_v2, %v1664_v8  ;;  %v1674_v26 = vsel %vm1658_vm4, %v5017_v3, %v1666_v9  ;;  %v5465_v58 = vld [vmem:[%s6502_s4 + $0x1a0] ss:$8 sps:$4 sm:$0xff]   ;;  %v5470_v59 = vld [vmem:[%s6502_s4 + $0x1b4] ss:$8 sps:$4 sm:$0xff]   ;;  %v5480_v4 = vld [vmem:[%s6502_s4 + $0x1f0] ss:$8 sps:$4 sm:$0xff]  }
 0x1cd   :  { %vm1659_vm5 = vcmp.gt.f32.partialorder %v5014_v10, 0.0  ;;  %v1667_v19 = vmul.f32 0.2, %v5014_v10  ;;  %vm1661_vm6 = vcmp.gt.f32.partialorder %v5018_v12, 0.0  ;;  %v1669_v20 = vmul.f32 0.2, %v5018_v12 }
 0x1ce   :  { %vm1660_vm7 = vcmp.gt.f32.partialorder %v5015_v17, 0.0  ;;  %v1668_v21 = vmul.f32 0.2, %v5015_v17  ;;  %vm1662_vm8 = vcmp.gt.f32.partialorder %v5019_v18, 0.0  ;;  %v1670_v22 = vmul.f32 0.2, %v5019_v18 }
 0x1cf   :  { %v1675_v23 = vsel %vm1659_vm5, %v5014_v10, %v1667_v19  ;;  %v6208_v24 = vsel %vm1661_vm6, %v5018_v12, %v1669_v20  ;;  %v5471_v62 = vld [vmem:[%s6502_s4 + $0x1c0] ss:$8 sps:$4 sm:$0xff]   ;;  %v5476_v63 = vld [vmem:[%s6502_s4 + $0x1d4] ss:$8 sps:$4 sm:$0xff]  }
 0x1d0   :  { %v1679_v27 = vpack.c.bf16 %v1675_v23, %v1671_v15  ;;  %v1681_v28 = vpack.c.bf16 %v6208_v24, %v6206_v16  ;;  %v1676_v29 = vsel %vm1660_vm7, %v5015_v17, %v1668_v21  ;;  %v1678_v30 = vsel %vm1662_vm8, %v5019_v18, %v1670_v22  ;;  %v5477_v2 = vld [vmem:[%s6502_s4 + $0x1e0] ss:$8 sps:$4 sm:$0xff]   ;;  %v5482_v3 = vld [vmem:[%s6502_s4 + $0x1f4] ss:$8 sps:$4 sm:$0xff]  }
 0x1d1   :  { %v1680_v31 = vpack.c.bf16 %v1676_v29, %v1672_v25  ;;  %v1682_v33 = vpack.c.bf16 %v1678_v30, %v1674_v26  ;;  %v5491_v5 = vld [vmem:[%s6504_s6 + $0x44] ss:$16 sps:$4 sm:$0xff]   ;;  %v5489_v6 = vld [vmem:[%s6504_s6 + $0x40] ss:$16 sps:$4 sm:$0xff]   ;;  %v5509_v18 = vld [vmem:[%s6504_s6 + $0xc] ss:$16 sps:$4 sm:$0xff]  }
 0x1d2   :  { %2396 = vmatprep.subr.bf16.mxu1 %v5491_v5  ;;  %v5494_v7 = vld [vmem:[%s6504_s6 + $0x64] ss:$16 sps:$4 sm:$0xff]   ;;  %v5492_v8 = vld [vmem:[%s6504_s6 + $0x60] ss:$16 sps:$4 sm:$0xff]   ;;  %v5536_v20 = vld [vmem:[#allocation4 + $0xc] ss:$28 sps:$4 sm:$0xff]  }
 0x1d3   :  { %2111 = vmatprep.mubr.bf16.mxu0 %v1680_v31  ;;  %2397 = vmatpush1.bf16.msra.mxu1 %v5489_v6  ;;  %v5497_v9 = vld [vmem:[%s6504_s6 + $0x84] ss:$16 sps:$4 sm:$0xff]   ;;  %v5495_v10 = vld [vmem:[%s6504_s6 + $0x80] ss:$16 sps:$4 sm:$0xff]   ;;  %v5548_v23 = vld [vmem:[#allocation4 + $0x7c] ss:$28 sps:$4 sm:$0xff]  }
 0x1d4   :  { %2112 = vmatmul.mubr.bf16.vlgmr.msra.gmra.mrb[4].mxu0 %v1679_v27  ;;  %2398 = vmatprep.subr.bf16.mxu1 %v5494_v7  ;;  %v5500_v12 = vld [vmem:[%s6504_s6 + $0xa4] ss:$16 sps:$4 sm:$0xff]   ;;  %v5498_v13 = vld [vmem:[%s6504_s6 + $0xa0] ss:$16 sps:$4 sm:$0xff]   ;;  %v5560_v27 = vld [vmem:[#allocation4 + $0xec] ss:$28 sps:$4 sm:$0xff]  }
 0x1d5   :  { %2123 = vmatpush1.bf16.msra.mxu0 %v5435_v32  ;;  %2154 = vmatprep.mubr.bf16.mxu0 %v1682_v33  ;;  %v5503_v14 = vld [vmem:[%s6504_s6 + $0xc4] ss:$16 sps:$4 sm:$0xff]   ;;  %v5501_v15 = vld [vmem:[%s6504_s6 + $0xc0] ss:$16 sps:$4 sm:$0xff]   ;;  %v5572_v31 = vld [vmem:[#allocation4 + $0x15c] ss:$28 sps:$4 sm:$0xff]  }
 0x1d6   :  { %2124 = vmatprep.subr.bf16.mxu0 %v5440_v34  ;;  %v5506_v16 = vld [vmem:[%s6504_s6 + $0xe4] ss:$16 sps:$4 sm:$0xff]   ;;  %v5504_v17 = vld [vmem:[%s6504_s6 + $0xe0] ss:$16 sps:$4 sm:$0xff]   ;;  %v2172_v5 = vld [vmem:[%s6499_s1 + $0x8] sm:$0xff] }
 0x1d7   :  { %2399 = vmatpush1.bf16.msra.mxu1 %v5492_v8  ;;  %v5534_v19 = vld [vmem:[#allocation4 + $0x8] ss:$28 sps:$4 sm:$0xff]   ;;  %v5540_v22 = vld [vmem:[#allocation4 + $0x40] ss:$28 sps:$4 sm:$0xff]   ;;  %v5546_v24 = vld [vmem:[#allocation4 + $0x78] ss:$28 sps:$4 sm:$0xff]  }
 0x1d8   :  { %2400 = vmatprep.subr.bf16.mxu1 %v5497_v9  ;;  %v5542_v21 = vld [vmem:[#allocation4 + $0x44] ss:$28 sps:$4 sm:$0xff]   ;;  %v5554_v25 = vld [vmem:[#allocation4 + $0xb4] ss:$28 sps:$4 sm:$0xff]  }
 0x1d9   :  { %2125 = vmatpush1.bf16.msra.mxu0 %v5438_v35  ;;  %v5552_v26 = vld [vmem:[#allocation4 + $0xb0] ss:$28 sps:$4 sm:$0xff]   ;;  %v5566_v29 = vld [vmem:[#allocation4 + $0x124] ss:$28 sps:$4 sm:$0xff]   ;;  %v5570_v32 = vld [vmem:[#allocation4 + $0x158] ss:$28 sps:$4 sm:$0xff]  }
 0x1da   :  { %2126 = vmatprep.subr.bf16.mxu0 %v5443_v36  ;;  %v5564_v30 = vld [vmem:[#allocation4 + $0x120] ss:$28 sps:$4 sm:$0xff]   ;;  %v5578_v33 = vld [vmem:[#allocation4 + $0x194] ss:$28 sps:$4 sm:$0xff]   ;;  %v5584_v35 = vld [vmem:[#allocation4 + $0x1cc] ss:$28 sps:$4 sm:$0xff]  }
 0x1db   :  { %2401 = vmatpush1.bf16.msra.mxu1 %v5495_v10  ;;  %v5576_v34 = vld [vmem:[#allocation4 + $0x190] ss:$28 sps:$4 sm:$0xff]   ;;  %v5582_v36 = vld [vmem:[#allocation4 + $0x1c8] ss:$28 sps:$4 sm:$0xff]  }
 0x1dc   :  { %2402 = vmatprep.subr.bf16.mxu1 %v5500_v12  ;;  %v5507_v12 = vld [vmem:[%s6504_s6 + $0x8] ss:$16 sps:$4 sm:$0xff]  }
 0x1dd   :  { %2127 = vmatpush1.bf16.msra.mxu0 %v5441_v37  ;;  %v5590_v37 = vld [vmem:[#allocation4 + $0x204] ss:$28 sps:$4 sm:$0xff]  }
 0x1de   :  { %2128 = vmatprep.subr.bf16.mxu0 %v5446_v38  ;;  %v5588_v38 = vld [vmem:[#allocation4 + $0x200] ss:$28 sps:$4 sm:$0xff]  }
 0x1df   :  { %2403 = vmatpush1.bf16.msra.mxu1 %v5498_v13 }
 0x1e0   :  { %2404 = vmatprep.subr.bf16.mxu1 %v5503_v14  ;;  %v5512_v14 = vld [vmem:[%s6504_s6 + $0x2c] ss:$16 sps:$4 sm:$0xff]  }
 0x1e1   :  { %2129 = vmatpush1.bf16.msra.mxu0 %v5444_v39  ;;  %v5596_v39 = vld [vmem:[#allocation4 + $0x23c] ss:$28 sps:$4 sm:$0xff]  }
 0x1e2   :  { %2130 = vmatprep.subr.bf16.mxu0 %v5449_v40  ;;  %v5594_v40 = vld [vmem:[#allocation4 + $0x238] ss:$28 sps:$4 sm:$0xff]  }
 0x1e3   :  { %2405 = vmatpush1.bf16.msra.mxu1 %v5501_v15  ;;  %v5510_v15 = vld [vmem:[%s6504_s6 + $0x28] ss:$16 sps:$4 sm:$0xff]  }
 0x1e4   :  { %2406 = vmatprep.subr.bf16.mxu1 %v5506_v16  ;;  %v5515_v16 = vld [vmem:[%s6504_s6 + $0x4c] ss:$16 sps:$4 sm:$0xff]  }
 0x1e5   :  { %2131 = vmatpush1.bf16.msra.mxu0 %v5447_v41  ;;  %v5602_v41 = vld [vmem:[#allocation4 + $0x274] ss:$28 sps:$4 sm:$0xff]  }
 0x1e6   :  { %2132 = vmatprep.subr.bf16.mxu0 %v5452_v42  ;;  %v5600_v42 = vld [vmem:[#allocation4 + $0x270] ss:$28 sps:$4 sm:$0xff]  }
 0x1e7   :  { %2407 = vmatpush1.bf16.msra.mxu1 %v5504_v17  ;;  %v5513_v17 = vld [vmem:[%s6504_s6 + $0x48] ss:$16 sps:$4 sm:$0xff]  }
 0x1e8   :  { %2435 = vmatprep.subr.bf16.mxu1 %v5509_v18  ;;  %v5518_v18 = vld [vmem:[%s6504_s6 + $0x6c] ss:$16 sps:$4 sm:$0xff]  }
 0x1e9   :  { %2133 = vmatpush1.bf16.msra.mxu0 %v5450_v43  ;;  %v5608_v43 = vld [vmem:[#allocation4 + $0x2ac] ss:$28 sps:$4 sm:$0xff]  }
 0x1ea   :  { %2134 = vmatprep.subr.bf16.mxu0 %v5455_v44  ;;  %v5606_v44 = vld [vmem:[#allocation4 + $0x2a8] ss:$28 sps:$4 sm:$0xff]  }
 0x1ed   :  { %2135 = vmatpush1.bf16.msra.mxu0 %v5453_v45  ;;  %v5614_v45 = vld [vmem:[#allocation4 + $0x2e4] ss:$28 sps:$4 sm:$0xff]  }
 0x1ee   :  { %2136 = vmatprep.subr.bf16.mxu0 %v5458_v46  ;;  %v5612_v46 = vld [vmem:[#allocation4 + $0x2e0] ss:$28 sps:$4 sm:$0xff]  }
 0x1f1   :  { %2137 = vmatpush1.bf16.msra.mxu0 %v5456_v47  ;;  %v1747_v47 = vld [vmem:[%s6503_s5] sm:$0x3] }
 0x1f2   :  { %2138 = vmatprep.subr.bf16.mxu0 %v5461_v48  ;;  %v1752_v48 = vrot.slane %v1747_v47, %v6188_v51 }
 0x1f5   :  { %2139 = vmatpush1.bf16.msra.mxu0 %v5459_v49  ;;  %v1756_v49 = vrot.slane %v1747_v47, %v6197_v54  ;;  %v5593_v47 = vld [vmem:[#allocation4 + $0x234] ss:$28 sps:$4 sm:$0xff]  }
 0x1f6   :  { %2140 = vmatprep.subr.bf16.mxu0 %v5464_v53 }
 0x1f9   :  { %2141 = vmatpush1.bf16.msra.mxu0 %v5462_v56 }
 0x1fa   :  { %2142 = vmatprep.subr.bf16.mxu0 %v5467_v57 }
 0x1fd   :  { %2143 = vmatpush1.bf16.msra.mxu0 %v5465_v58 }
 0x1fe   :  { %2144 = vmatprep.subr.bf16.mxu0 %v5470_v59 }
 0x201   :  { %2145 = vmatpush1.bf16.msra.mxu0 %v5468_v60 }
 0x202   :  { %2146 = vmatprep.subr.bf16.mxu0 %v5473_v61 }
 0x205   :  { %2147 = vmatpush1.bf16.msra.mxu0 %v5471_v62 }
 0x206   :  { %2148 = vmatprep.subr.bf16.mxu0 %v5476_v63 }
 0x209   :  { %2149 = vmatpush1.bf16.msra.mxu0 %v5474_v0 }
 0x20a   :  { %2150 = vmatprep.subr.bf16.mxu0 %v5479_v1 }
 0x20d   :  { %2151 = vmatpush1.bf16.msra.mxu0 %v5477_v2 }
 0x20e   :  { %2152 = vmatprep.subr.bf16.mxu0 %v5482_v3  ;;  %v2171_v3 = vld [vmem:[%s6499_s1] sm:$0xff] }
 0x211   :  { %2153 = vmatpush1.bf16.msra.mxu0 %v5480_v4 }
 0x212   :  { %4037 = vmatprep.subr.bf16.mxu0 %v5536_v20  ;;  %v5519_v20 = vld [vmem:[%s6504_s6 + $0x88] ss:$16 sps:$4 sm:$0xff]  }
 0x214   :  { %2155 = vmatmul.mubr.bf16.vlgmr.msra.gmra.mrb[4].mxu0 %v1681_v28  ;;  %v5558_v28 = vld [vmem:[#allocation4 + $0xe8] ss:$28 sps:$4 sm:$0xff]  }
 0x215   :  { %4038 = vmatpush1.bf16.msra.mxu0 %v5534_v19  ;;  %v5521_v19 = vld [vmem:[%s6504_s6 + $0x8c] ss:$16 sps:$4 sm:$0xff]  }
 0x216   :  { %4039 = vmatprep.subr.bf16.mxu0 %v5542_v21  ;;  %v5524_v21 = vld [vmem:[%s6504_s6 + $0xac] ss:$16 sps:$4 sm:$0xff]  }
 0x219   :  { %4040 = vmatpush1.bf16.msra.mxu0 %v5540_v22  ;;  %v5522_v22 = vld [vmem:[%s6504_s6 + $0xa8] ss:$16 sps:$4 sm:$0xff]  }
 0x21a   :  { %4041 = vmatprep.subr.bf16.mxu0 %v5548_v23  ;;  %v5527_v23 = vld [vmem:[%s6504_s6 + $0xcc] ss:$16 sps:$4 sm:$0xff]  }
 0x21d   :  { %4042 = vmatpush1.bf16.msra.mxu0 %v5546_v24  ;;  %v5525_v24 = vld [vmem:[%s6504_s6 + $0xc8] ss:$16 sps:$4 sm:$0xff]  }
 0x21e   :  { %4043 = vmatprep.subr.bf16.mxu0 %v5554_v25  ;;  %v5530_v25 = vld [vmem:[%s6504_s6 + $0xec] ss:$16 sps:$4 sm:$0xff]  }
 0x221   :  { %4044 = vmatpush1.bf16.msra.mxu0 %v5552_v26  ;;  %v5528_v26 = vld [vmem:[%s6504_s6 + $0xe8] ss:$16 sps:$4 sm:$0xff]  }
 0x222   :  { %4045 = vmatprep.subr.bf16.mxu0 %v5560_v27  ;;  %v5533_v27 = vld [vmem:[#allocation4 + $0x4] ss:$28 sps:$4 sm:$0xff]  }
 0x225   :  { %4046 = vmatpush1.bf16.msra.mxu0 %v5558_v28  ;;  %v5531_v28 = vld [vmem:[#allocation4] ss:$28 sps:$4 sm:$0xff]  }
 0x226   :  { %4047 = vmatprep.subr.bf16.mxu0 %v5566_v29  ;;  %v5539_v29 = vld [vmem:[#allocation4 + $0x3c] ss:$28 sps:$4 sm:$0xff]  }
 0x229   :  { %4048 = vmatpush1.bf16.msra.mxu0 %v5564_v30  ;;  %v5537_v30 = vld [vmem:[#allocation4 + $0x38] ss:$28 sps:$4 sm:$0xff]  }
 0x22a   :  { %4049 = vmatprep.subr.bf16.mxu0 %v5572_v31  ;;  %v5545_v31 = vld [vmem:[#allocation4 + $0x74] ss:$28 sps:$4 sm:$0xff]  }
 0x22d   :  { %4050 = vmatpush1.bf16.msra.mxu0 %v5570_v32  ;;  %v5543_v32 = vld [vmem:[#allocation4 + $0x70] ss:$28 sps:$4 sm:$0xff]  }
 0x22e   :  { %4051 = vmatprep.subr.bf16.mxu0 %v5578_v33  ;;  %v5551_v33 = vld [vmem:[#allocation4 + $0xac] ss:$28 sps:$4 sm:$0xff]  }
 0x231   :  { %4052 = vmatpush1.bf16.msra.mxu0 %v5576_v34  ;;  %v5549_v34 = vld [vmem:[#allocation4 + $0xa8] ss:$28 sps:$4 sm:$0xff]  }
 0x232   :  { %4053 = vmatprep.subr.bf16.mxu0 %v5584_v35  ;;  %v5557_v35 = vld [vmem:[#allocation4 + $0xe4] ss:$28 sps:$4 sm:$0xff]  }
 0x235   :  { %4054 = vmatpush1.bf16.msra.mxu0 %v5582_v36  ;;  %v5555_v36 = vld [vmem:[#allocation4 + $0xe0] ss:$28 sps:$4 sm:$0xff]  }
 0x236   :  { %4055 = vmatprep.subr.bf16.mxu0 %v5590_v37  ;;  %v5563_v37 = vld [vmem:[#allocation4 + $0x11c] ss:$28 sps:$4 sm:$0xff]  }
 0x239   :  { %4056 = vmatpush1.bf16.msra.mxu0 %v5588_v38  ;;  %v5561_v38 = vld [vmem:[#allocation4 + $0x118] ss:$28 sps:$4 sm:$0xff]  }
 0x23a   :  { %4057 = vmatprep.subr.bf16.mxu0 %v5596_v39  ;;  %v5569_v39 = vld [vmem:[#allocation4 + $0x154] ss:$28 sps:$4 sm:$0xff]  }
 0x23d   :  { %4058 = vmatpush1.bf16.msra.mxu0 %v5594_v40  ;;  %v5567_v40 = vld [vmem:[#allocation4 + $0x150] ss:$28 sps:$4 sm:$0xff]  }
 0x23e   :  { %4059 = vmatprep.subr.bf16.mxu0 %v5602_v41  ;;  %v5575_v41 = vld [vmem:[#allocation4 + $0x18c] ss:$28 sps:$4 sm:$0xff]  }
 0x241   :  { %4060 = vmatpush1.bf16.msra.mxu0 %v5600_v42  ;;  %v5573_v42 = vld [vmem:[#allocation4 + $0x188] ss:$28 sps:$4 sm:$0xff]  }
 0x242   :  { %4061 = vmatprep.subr.bf16.mxu0 %v5608_v43  ;;  %v5581_v43 = vld [vmem:[#allocation4 + $0x1c4] ss:$28 sps:$4 sm:$0xff]  }
 0x245   :  { %4062 = vmatpush1.bf16.msra.mxu0 %v5606_v44  ;;  %v5579_v44 = vld [vmem:[#allocation4 + $0x1c0] ss:$28 sps:$4 sm:$0xff]  }
 0x246   :  { %4063 = vmatprep.subr.bf16.mxu0 %v5614_v45  ;;  %v5587_v45 = vld [vmem:[#allocation4 + $0x1fc] ss:$28 sps:$4 sm:$0xff]  }
 0x249   :  { %4064 = vmatpush1.bf16.msra.mxu0 %v5612_v46  ;;  %v5585_v46 = vld [vmem:[#allocation4 + $0x1f8] ss:$28 sps:$4 sm:$0xff]  }
 0x2e7   :  { %v2156_v53 = vpop.f32.mrb[4].mxu0 }
 0x2e8   :  { %v5020_v56 = vadd.f32 %v2156_v53, %v1752_v48  ;;  %v2158_v57 = vpop.f32.mrb[5].mxu0  ;;  %v5597_v53 = vld [vmem:[#allocation4 + $0x268] ss:$28 sps:$4 sm:$0xff]  }
 0x2e9   :  { %v5021_v58 = vadd.f32 %v2158_v57, %v1756_v49  ;;  %v2160_v59 = vpop.f32.mrb[6].mxu0  ;;  %v5603_v57 = vld [vmem:[#allocation4 + $0x2a0] ss:$28 sps:$4 sm:$0xff]  }
 0x2ea   :  { %4413 = vst [vmem:[%s6509_s11] sm:$0xff] %v5020_v56  ;;  %v5022_v60 = vadd.f32 %v2160_v59, %v1752_v48  ;;  %v2162_v61 = vpop.f32.mrb[7].mxu0  ;;  %v5591_v48 = vld [vmem:[#allocation4 + $0x230] ss:$28 sps:$4 sm:$0xff]   ;;  %v5609_v59 = vld [vmem:[#allocation4 + $0x2d8] ss:$28 sps:$4 sm:$0xff]  }
 0x2eb   :  { %v2165_v62 = vmul.f32 0.5, %v5021_v58  ;;  %4414 = vst [vmem:[%s6509_s11 + $0x8] sm:$0xff] %v5021_v58  ;;  %v5023_v63 = vadd.f32 %v2162_v61, %v1756_v49  ;;  %v5599_v49 = vld [vmem:[#allocation4 + $0x26c] ss:$28 sps:$4 sm:$0xff]   ;;  %v5611_v58 = vld [vmem:[#allocation4 + $0x2dc] ss:$28 sps:$4 sm:$0xff]  }
 0x2ec   :  { %4415 = vst [vmem:[%s6509_s11 + $0x10] sm:$0xff] %v5022_v60  ;;  %v5620_v61 = vld [vmem:[#allocation4 + $0x31c] ss:$28 sps:$4 sm:$0xff]  }
 0x2ed   :  { %v2167_v0 = vmul.f32 1.442695, %v2165_v62  ;;  %v2166_v1 = vmul.f32 0.5, %v5023_v63  ;;  %4416 = vst [vmem:[%s6509_s11 + $0x18] sm:$0xff] %v5023_v63  ;;  %v5615_v62 = vld [vmem:[#allocation4 + $0x310] ss:$28 sps:$4 sm:$0xff]   ;;  %4065 = vmatprep.subr.bf16.mxu0 %v5620_v61 }
 0x2ee   :  { %v5618_v63 = vld [vmem:[#allocation4 + $0x318] ss:$28 sps:$4 sm:$0xff]   ;;  %v5663_v61 = vld [vmem:[#allocation4 + $0x4d0] ss:$28 sps:$4 sm:$0xff]  }
 0x2ef   :  { %5851 = vpow2.f32 %v2167_v0  ;;  %v2169_v2 = vmul.f32 1.442695, %v2166_v1  ;;  %4066 = vmatpush1.bf16.msra.mxu0 %v5618_v63  ;;  %v5623_v0 = vld [vmem:[#allocation4 + $0x34c] ss:$28 sps:$4 sm:$0xff]   ;;  %v5626_v1 = vld [vmem:[#allocation4 + $0x354] ss:$28 sps:$4 sm:$0xff]  }
 0x2f0   :  { %4067 = vmatprep.subr.bf16.mxu0 %v5626_v1  ;;  %v5671_v1 = vld [vmem:[#allocation4 + $0x50c] ss:$28 sps:$4 sm:$0xff]  }
 0x2f1   :  { %5853 = vpow2.f32 %v2169_v2  ;;  %v5621_v2 = vld [vmem:[#allocation4 + $0x348] ss:$28 sps:$4 sm:$0xff]  }
 0x2f9   :  { %v5852_v4 = vpop.eup %5851 }
 0x2fa   :  { %v2173_v6 = vmul.f32 %v5852_v4, %v2171_v3  ;;  %v5624_v3 = vld [vmem:[#allocation4 + $0x350] ss:$28 sps:$4 sm:$0xff]   ;;  %v5629_v4 = vld [vmem:[#allocation4 + $0x384] ss:$28 sps:$4 sm:$0xff]  }
 0x2fb   :  { %v5854_v7 = vpop.eup %5853  ;;  %4068 = vmatpush1.bf16.msra.mxu0 %v5624_v3 }
 0x2fc   :  { %v2174_v8 = vmul.f32 %v5854_v7, %v2172_v5  ;;  %v2175_v9 = vadd.f32 %v5020_v56, %v2173_v6  ;;  %v5605_v56 = vld [vmem:[#allocation4 + $0x2a4] ss:$28 sps:$4 sm:$0xff]   ;;  %v5632_v5 = vld [vmem:[#allocation4 + $0x38c] ss:$28 sps:$4 sm:$0xff]  }
 0x2fd   :  { %4080 = vmatprep.subr.bf16.mxu0 %v5632_v5  ;;  %v6421_v6 = vld [vmem:[%s6505_s7] sm:$0xf] }
 0x2fe   :  { %v2176_v10 = vadd.f32 %v5022_v60, %v2174_v8  ;;  %v5617_v60 = vld [vmem:[#allocation4 + $0x314] ss:$28 sps:$4 sm:$0xff]   ;;  %v2215_v7 = vrot.slane %v6421_v6, %v6188_v51  ;;  %v2219_v8 = vrot.slane %v6421_v6, %v6197_v54 }
 0x300   :  { %v2177_v13 = vpack.c.bf16 %v2176_v10, %v2175_v9 }
 0x302   :  { %2425 = vmatmul.mubr.bf16.vlgmr.msra.gmra.mrb[4].mxu1 %v2177_v13 }
 0x303   :  { %2436 = vmatpush1.bf16.msra.mxu1 %v5507_v12  ;;  %2467 = vmatprep.mubr.bf16.mxu1 %v5965_v11  ;;  %v5516_v11 = vld [vmem:[%s6504_s6 + $0x68] ss:$16 sps:$4 sm:$0xff]  }
 0x304   :  { %2437 = vmatprep.subr.bf16.mxu1 %v5512_v14 }
 0x307   :  { %2438 = vmatpush1.bf16.msra.mxu1 %v5510_v15 }
 0x308   :  { %2439 = vmatprep.subr.bf16.mxu1 %v5515_v16 }
 0x30b   :  { %2440 = vmatpush1.bf16.msra.mxu1 %v5513_v17 }
 0x30c   :  { %2441 = vmatprep.subr.bf16.mxu1 %v5518_v18 }
 0x30f   :  { %2442 = vmatpush1.bf16.msra.mxu1 %v5516_v11 }
 0x310   :  { %2443 = vmatprep.subr.bf16.mxu1 %v5521_v19 }
 0x313   :  { %2444 = vmatpush1.bf16.msra.mxu1 %v5519_v20 }
 0x314   :  { %2445 = vmatprep.subr.bf16.mxu1 %v5524_v21 }
 0x317   :  { %2446 = vmatpush1.bf16.msra.mxu1 %v5522_v22 }
 0x318   :  { %2447 = vmatprep.subr.bf16.mxu1 %v5527_v23 }
 0x31b   :  { %2448 = vmatpush1.bf16.msra.mxu1 %v5525_v24 }
 0x31c   :  { %2449 = vmatprep.subr.bf16.mxu1 %v5530_v25 }
 0x31f   :  { %2450 = vmatpush1.bf16.msra.mxu1 %v5528_v26 }
 0x320   :  { %3951 = vmatprep.subr.bf16.mxu1 %v5533_v27  ;;  %v5627_v27 = vld [vmem:[#allocation4 + $0x380] ss:$28 sps:$4 sm:$0xff]  }
 0x322   :  { %2468 = vmatmul.mubr.bf16.vlgmr.msra.gmra.mrb[8].mxu1 %v2177_v13 }
 0x323   :  { %3952 = vmatpush1.bf16.msra.mxu1 %v5531_v28  ;;  %v5630_v28 = vld [vmem:[#allocation4 + $0x388] ss:$28 sps:$4 sm:$0xff]  }
 0x324   :  { %3953 = vmatprep.subr.bf16.mxu1 %v5539_v29  ;;  %v5635_v29 = vld [vmem:[#allocation4 + $0x3bc] ss:$28 sps:$4 sm:$0xff]  }
 0x327   :  { %3954 = vmatpush1.bf16.msra.mxu1 %v5537_v30  ;;  %v5638_v30 = vld [vmem:[#allocation4 + $0x3c4] ss:$28 sps:$4 sm:$0xff]  }
 0x328   :  { %3955 = vmatprep.subr.bf16.mxu1 %v5545_v31  ;;  %v5633_v31 = vld [vmem:[#allocation4 + $0x3b8] ss:$28 sps:$4 sm:$0xff]  }
 0x32b   :  { %3956 = vmatpush1.bf16.msra.mxu1 %v5543_v32  ;;  %v5636_v32 = vld [vmem:[#allocation4 + $0x3c0] ss:$28 sps:$4 sm:$0xff]  }
 0x32c   :  { %3957 = vmatprep.subr.bf16.mxu1 %v5551_v33  ;;  %v5641_v33 = vld [vmem:[#allocation4 + $0x3f4] ss:$28 sps:$4 sm:$0xff]  }
 0x32f   :  { %3958 = vmatpush1.bf16.msra.mxu1 %v5549_v34  ;;  %v5644_v34 = vld [vmem:[#allocation4 + $0x3fc] ss:$28 sps:$4 sm:$0xff]  }
 0x330   :  { %3959 = vmatprep.subr.bf16.mxu1 %v5557_v35  ;;  %v5639_v35 = vld [vmem:[#allocation4 + $0x3f0] ss:$28 sps:$4 sm:$0xff]  }
 0x333   :  { %3960 = vmatpush1.bf16.msra.mxu1 %v5555_v36  ;;  %v5642_v36 = vld [vmem:[#allocation4 + $0x3f8] ss:$28 sps:$4 sm:$0xff]  }
 0x334   :  { %3961 = vmatprep.subr.bf16.mxu1 %v5563_v37  ;;  %v5647_v37 = vld [vmem:[#allocation4 + $0x42c] ss:$28 sps:$4 sm:$0xff]  }
 0x337   :  { %3962 = vmatpush1.bf16.msra.mxu1 %v5561_v38  ;;  %v5650_v38 = vld [vmem:[#allocation4 + $0x434] ss:$28 sps:$4 sm:$0xff]  }
 0x338   :  { %3963 = vmatprep.subr.bf16.mxu1 %v5569_v39  ;;  %v5645_v39 = vld [vmem:[#allocation4 + $0x428] ss:$28 sps:$4 sm:$0xff]  }
 0x33b   :  { %3964 = vmatpush1.bf16.msra.mxu1 %v5567_v40  ;;  %v5648_v40 = vld [vmem:[#allocation4 + $0x430] ss:$28 sps:$4 sm:$0xff]  }
 0x33c   :  { %3965 = vmatprep.subr.bf16.mxu1 %v5575_v41  ;;  %v5653_v41 = vld [vmem:[#allocation4 + $0x464] ss:$28 sps:$4 sm:$0xff]  }
 0x33f   :  { %3966 = vmatpush1.bf16.msra.mxu1 %v5573_v42  ;;  %v5656_v42 = vld [vmem:[#allocation4 + $0x46c] ss:$28 sps:$4 sm:$0xff]  }
 0x340   :  { %3967 = vmatprep.subr.bf16.mxu1 %v5581_v43  ;;  %v5651_v43 = vld [vmem:[#allocation4 + $0x460] ss:$28 sps:$4 sm:$0xff]  }
 0x343   :  { %3968 = vmatpush1.bf16.msra.mxu1 %v5579_v44  ;;  %v5654_v44 = vld [vmem:[#allocation4 + $0x468] ss:$28 sps:$4 sm:$0xff]  }
 0x344   :  { %3969 = vmatprep.subr.bf16.mxu1 %v5587_v45  ;;  %v5659_v45 = vld [vmem:[#allocation4 + $0x49c] ss:$28 sps:$4 sm:$0xff]  }
 0x347   :  { %3970 = vmatpush1.bf16.msra.mxu1 %v5585_v46  ;;  %v5662_v46 = vld [vmem:[#allocation4 + $0x4a4] ss:$28 sps:$4 sm:$0xff]  }
 0x348   :  { %3971 = vmatprep.subr.bf16.mxu1 %v5593_v47  ;;  %v2223_v47 = vrot.slane %v6421_v6, %v6191_v52 }
 0x34b   :  { %3972 = vmatpush1.bf16.msra.mxu1 %v5591_v48  ;;  %v5657_v48 = vld [vmem:[#allocation4 + $0x498] ss:$28 sps:$4 sm:$0xff]  }
 0x34c   :  { %3973 = vmatprep.subr.bf16.mxu1 %v5599_v49  ;;  %v5660_v49 = vld [vmem:[#allocation4 + $0x4a0] ss:$28 sps:$4 sm:$0xff]  }
 0x34f   :  { %3974 = vmatpush1.bf16.msra.mxu1 %v5597_v53  ;;  %v2227_v53 = vrot.slane %v6421_v6, %v6200_v55 }
 0x350   :  { %3975 = vmatprep.subr.bf16.mxu1 %v5605_v56  ;;  %v5665_v56 = vld [vmem:[#allocation4 + $0x4d4] ss:$28 sps:$4 sm:$0xff]  }
 0x353   :  { %3976 = vmatpush1.bf16.msra.mxu1 %v5603_v57  ;;  %v5668_v57 = vld [vmem:[#allocation4 + $0x4dc] ss:$28 sps:$4 sm:$0xff]  }
 0x354   :  { %3977 = vmatprep.subr.bf16.mxu1 %v5611_v58 }
 0x357   :  { %3978 = vmatpush1.bf16.msra.mxu1 %v5609_v59 }
 0x358   :  { %3979 = vmatprep.subr.bf16.mxu1 %v5617_v60 }
 0x35b   :  { %3980 = vmatpush1.bf16.msra.mxu1 %v5615_v62  ;;  %v5666_v62 = vld [vmem:[#allocation4 + $0x4d8] ss:$28 sps:$4 sm:$0xff]  }
 0x35c   :  { %3981 = vmatprep.subr.bf16.mxu1 %v5623_v0 }
 0x35f   :  { %3982 = vmatpush1.bf16.msra.mxu1 %v5621_v2  ;;  %v5674_v2 = vld [vmem:[#allocation4 + $0x514] ss:$28 sps:$4 sm:$0xff]  }
 0x360   :  { %3994 = vmatprep.subr.bf16.mxu1 %v5629_v4 }
 0x3d5   :  { %v2426_v9 = vpop.f32.mrb[4].mxu1 }
 0x3d6   :  { %v2427_v10 = vadd.f32 %v2426_v9, %v2215_v7  ;;  %v2428_v12 = vpop.f32.mrb[5].mxu1  ;;  %v5672_v9 = vld [vmem:[#allocation4 + $0x510] ss:$28 sps:$4 sm:$0xff]  }
 0x3d7   :  { %v2429_v13 = vadd.f32 %v2428_v12, %v2219_v8  ;;  %v2430_v14 = vpop.f32.mrb[6].mxu1  ;;  %v5677_v12 = vld [vmem:[#allocation4 + $0x544] ss:$28 sps:$4 sm:$0xff]  }
 0x3d8   :  { %v2486_v15 = vmul.f32 0.2, %v2427_v10  ;;  %v2431_v16 = vadd.f32 %v2430_v14, %v2215_v7  ;;  %v2432_v17 = vpop.f32.mrb[7].mxu1  ;;  %vm2478_vm9 = vcmp.gt.f32.partialorder %v2427_v10, 0.0  ;;  %v5669_v7 = vld [vmem:[#allocation4 + $0x508] ss:$28 sps:$4 sm:$0xff]  }
 0x3d9   :  { %v2487_v18 = vmul.f32 0.2, %v2429_v13  ;;  %v2433_v11 = vadd.f32 %v2432_v17, %v2219_v8  ;;  %vm2479_vm10 = vcmp.gt.f32.partialorder %v2429_v13, 0.0  ;;  %v5680_v14 = vld [vmem:[#allocation4 + $0x54c] ss:$28 sps:$4 sm:$0xff]  }
 0x3da   :  { %vm2482_vm11 = vcmp.gt.f32.partialorder %v2431_v16, 0.0  ;;  %v2490_v19 = vmul.f32 0.2, %v2431_v16  ;;  %v2494_v21 = vsel %vm2478_vm9, %v2427_v10, %v2486_v15 }
 0x3db   :  { %vm2483_vm12 = vcmp.gt.f32.partialorder %v2433_v11, 0.0  ;;  %v2491_v20 = vmul.f32 0.2, %v2433_v11  ;;  %v2495_v23 = vsel %vm2479_vm10, %v2429_v13, %v2487_v18 }
 0x3dc   :  { %v2498_v22 = vsel %vm2482_vm11, %v2431_v16, %v2490_v19 }
 0x3dd   :  { %v6427_v24 = vpack.c.bf16 %v2498_v22, %v2494_v21  ;;  %v2499_v25 = vsel %vm2483_vm12, %v2433_v11, %v2491_v20  ;;  %v5675_v20 = vld [vmem:[#allocation4 + $0x540] ss:$28 sps:$4 sm:$0xff]   ;;  %v5678_v21 = vld [vmem:[#allocation4 + $0x548] ss:$28 sps:$4 sm:$0xff]  }
 0x3de   :  { %v6429_v26 = vpack.c.bf16 %v2499_v25, %v2495_v23  ;;  %v5683_v22 = vld [vmem:[#allocation4 + $0x57c] ss:$28 sps:$4 sm:$0xff]   ;;  %v5686_v23 = vld [vmem:[#allocation4 + $0x584] ss:$28 sps:$4 sm:$0xff]  }
 0x3df   :  { %v5681_v25 = vld [vmem:[#allocation4 + $0x578] ss:$28 sps:$4 sm:$0xff]  }
 0x3e0   :  { %3983 = vmatprep.mubr.bf16.mxu1 %v6429_v26  ;;  %4069 = vmatprep.mubr.bf16.mxu0 %v6429_v26 }
 0x3e1   :  { %3984 = vmatmul.mubr.bf16.vlgmr.msra.gmra.mrb[12].mxu1 %v6427_v24  ;;  %4070 = vmatmul.mubr.bf16.vlgmr.msra.gmra.mrb[8].mxu0 %v6427_v24 }
 0x3e2   :  { %3995 = vmatpush1.bf16.msra.mxu1 %v5627_v27  ;;  %4081 = vmatpush1.bf16.msra.mxu0 %v5630_v28  ;;  %v5684_v27 = vld [vmem:[#allocation4 + $0x580] ss:$28 sps:$4 sm:$0xff]   ;;  %v5689_v28 = vld [vmem:[#allocation4 + $0x5b4] ss:$28 sps:$4 sm:$0xff]  }
 0x3e3   :  { %3996 = vmatprep.subr.bf16.mxu1 %v5635_v29  ;;  %4082 = vmatprep.subr.bf16.mxu0 %v5638_v30  ;;  %v5692_v29 = vld [vmem:[#allocation4 + $0x5bc] ss:$28 sps:$4 sm:$0xff]   ;;  %v5687_v30 = vld [vmem:[#allocation4 + $0x5b0] ss:$28 sps:$4 sm:$0xff]  }
 0x3e6   :  { %3997 = vmatpush1.bf16.msra.mxu1 %v5633_v31  ;;  %4083 = vmatpush1.bf16.msra.mxu0 %v5636_v32  ;;  %v5690_v31 = vld [vmem:[#allocation4 + $0x5b8] ss:$28 sps:$4 sm:$0xff]   ;;  %v5695_v32 = vld [vmem:[#allocation4 + $0x5ec] ss:$28 sps:$4 sm:$0xff]  }
 0x3e7   :  { %3998 = vmatprep.subr.bf16.mxu1 %v5641_v33  ;;  %4084 = vmatprep.subr.bf16.mxu0 %v5644_v34  ;;  %v5698_v33 = vld [vmem:[#allocation4 + $0x5f4] ss:$28 sps:$4 sm:$0xff]   ;;  %v5693_v34 = vld [vmem:[#allocation4 + $0x5e8] ss:$28 sps:$4 sm:$0xff]  }
 0x3ea   :  { %3999 = vmatpush1.bf16.msra.mxu1 %v5639_v35  ;;  %4085 = vmatpush1.bf16.msra.mxu0 %v5642_v36  ;;  %v5696_v35 = vld [vmem:[#allocation4 + $0x5f0] ss:$28 sps:$4 sm:$0xff]   ;;  %v5701_v36 = vld [vmem:[#allocation4 + $0x624] ss:$28 sps:$4 sm:$0xff]  }
 0x3eb   :  { %4000 = vmatprep.subr.bf16.mxu1 %v5647_v37  ;;  %4086 = vmatprep.subr.bf16.mxu0 %v5650_v38  ;;  %v5704_v37 = vld [vmem:[#allocation4 + $0x62c] ss:$28 sps:$4 sm:$0xff]   ;;  %v5699_v38 = vld [vmem:[#allocation4 + $0x620] ss:$28 sps:$4 sm:$0xff]  }
 0x3ee   :  { %4001 = vmatpush1.bf16.msra.mxu1 %v5645_v39  ;;  %4087 = vmatpush1.bf16.msra.mxu0 %v5648_v40  ;;  %v5702_v39 = vld [vmem:[#allocation4 + $0x628] ss:$28 sps:$4 sm:$0xff]   ;;  %v5707_v40 = vld [vmem:[#allocation4 + $0x65c] ss:$28 sps:$4 sm:$0xff]  }
 0x3ef   :  { %4002 = vmatprep.subr.bf16.mxu1 %v5653_v41  ;;  %4088 = vmatprep.subr.bf16.mxu0 %v5656_v42  ;;  %v5710_v41 = vld [vmem:[#allocation4 + $0x664] ss:$28 sps:$4 sm:$0xff]   ;;  %v5705_v42 = vld [vmem:[#allocation4 + $0x658] ss:$28 sps:$4 sm:$0xff]  }
 0x3f2   :  { %4003 = vmatpush1.bf16.msra.mxu1 %v5651_v43  ;;  %4089 = vmatpush1.bf16.msra.mxu0 %v5654_v44  ;;  %v5708_v43 = vld [vmem:[#allocation4 + $0x660] ss:$28 sps:$4 sm:$0xff]   ;;  %v5713_v44 = vld [vmem:[#allocation4 + $0x694] ss:$28 sps:$4 sm:$0xff]  }
 0x3f3   :  { %4004 = vmatprep.subr.bf16.mxu1 %v5659_v45  ;;  %4090 = vmatprep.subr.bf16.mxu0 %v5662_v46  ;;  %v5716_v45 = vld [vmem:[#allocation4 + $0x69c] ss:$28 sps:$4 sm:$0xff]   ;;  %v5711_v46 = vld [vmem:[#allocation4 + $0x690] ss:$28 sps:$4 sm:$0xff]  }
 0x3f5   :  { %v2469_v58 = vpop.f32.mrb[8].mxu1 }
 0x3f6   :  { %v2470_v59 = vadd.f32 %v2469_v58, %v2223_v47  ;;  %v2471_v60 = vpop.f32.mrb[9].mxu1  ;;  %4005 = vmatpush1.bf16.msra.mxu1 %v5657_v48  ;;  %4091 = vmatpush1.bf16.msra.mxu0 %v5660_v49  ;;  %v5719_v48 = vld [vmem:[#allocation4 + $0x6cc] ss:$28 sps:$4 sm:$0xff]   ;;  %v5722_v49 = vld [vmem:[#allocation4 + $0x6d4] ss:$28 sps:$4 sm:$0xff]  }
 0x3f7   :  { %v2472_v63 = vadd.f32 %v2471_v60, %v2227_v53  ;;  %v2473_v0 = vpop.f32.mrb[10].mxu1  ;;  %4006 = vmatprep.subr.bf16.mxu1 %v5665_v56  ;;  %4092 = vmatprep.subr.bf16.mxu0 %v5668_v57  ;;  %v5720_v56 = vld [vmem:[#allocation4 + $0x6d0] ss:$28 sps:$4 sm:$0xff]   ;;  %v5726_v58 = vld [vmem:[#allocation4 + $0x1d8] ss:$28 sps:$4 sm:$0xff]  }
 0x3f8   :  { %v2488_v3 = vmul.f32 0.2, %v2470_v59  ;;  %v2474_v4 = vadd.f32 %v2473_v0, %v2223_v47  ;;  %v2475_v5 = vpop.f32.mrb[11].mxu1  ;;  %vm2480_vm13 = vcmp.gt.f32.partialorder %v2470_v59, 0.0  ;;  %v5714_v47 = vld [vmem:[#allocation4 + $0x698] ss:$28 sps:$4 sm:$0xff]  }
 0x3f9   :  { %v2489_v6 = vmul.f32 0.2, %v2472_v63  ;;  %v2476_v8 = vadd.f32 %v2475_v5, %v2227_v53  ;;  %vm2481_vm14 = vcmp.gt.f32.partialorder %v2472_v63, 0.0  ;;  %v5717_v53 = vld [vmem:[#allocation4 + $0x6c8] ss:$28 sps:$4 sm:$0xff]  }
 0x3fa   :  { %vm2484_vm15 = vcmp.gt.f32.partialorder %v2474_v4, 0.0  ;;  %v2492_v10 = vmul.f32 0.2, %v2474_v4  ;;  %4007 = vmatpush1.bf16.msra.mxu1 %v5663_v61  ;;  %4093 = vmatpush1.bf16.msra.mxu0 %v5666_v62  ;;  %v2496_v15 = vsel %vm2480_vm13, %v2470_v59, %v2488_v3  ;;  %v5725_v57 = vld [vmem:[#allocation4 + $0x14] ss:$28 sps:$4 sm:$0xff]  }
 0x3fb   :  { %vm2485_vm0 = vcmp.gt.f32.partialorder %v2476_v8, 0.0  ;;  %v2493_v13 = vmul.f32 0.2, %v2476_v8  ;;  %4008 = vmatprep.subr.bf16.mxu1 %v5671_v1  ;;  %4094 = vmatprep.subr.bf16.mxu0 %v5674_v2  ;;  %v2497_v17 = vsel %vm2481_vm14, %v2472_v63, %v2489_v6  ;;  %v5723_v59 = vld [vmem:[#allocation4 + $0x10] ss:$28 sps:$4 sm:$0xff]  }
 0x3fc   :  { %v2500_v16 = vsel %vm2484_vm15, %v2474_v4, %v2492_v10  ;;  %v5727_v60 = vld [vmem:[#allocation4 + $0x18] ss:$28 sps:$4 sm:$0xff]   ;;  %v5730_v61 = vld [vmem:[#allocation4 + $0x4c] ss:$28 sps:$4 sm:$0xff]   ;;  %v5735_v1 = vld [vmem:[#allocation4 + $0x84] ss:$28 sps:$4 sm:$0xff]  }
 0x3fd   :  { %v6439_v18 = vpack.c.bf16 %v2500_v16, %v2496_v15  ;;  %v2501_v11 = vsel %vm2485_vm0, %v2476_v8, %v2493_v13  ;;  %v5731_v62 = vld [vmem:[#allocation4 + $0x210] ss:$28 sps:$4 sm:$0xff]   ;;  %v5728_v63 = vld [vmem:[#allocation4 + $0x48] ss:$28 sps:$4 sm:$0xff]   ;;  %v5733_v3 = vld [vmem:[#allocation4 + $0x80] ss:$28 sps:$4 sm:$0xff]  }
 0x3fe   :  { %v6441_v19 = vpack.c.bf16 %v2501_v11, %v2497_v17  ;;  %4009 = vmatpush1.bf16.msra.mxu1 %v5669_v7  ;;  %4095 = vmatpush1.bf16.msra.mxu0 %v5672_v9  ;;  %v5732_v0 = vld [vmem:[#allocation4 + $0x50] ss:$28 sps:$4 sm:$0xff]   ;;  %v5736_v2 = vld [vmem:[#allocation4 + $0x248] ss:$28 sps:$4 sm:$0xff]   ;;  %v5740_v5 = vld [vmem:[#allocation4 + $0xbc] ss:$28 sps:$4 sm:$0xff]  }
 0x3ff   :  { %4010 = vmatprep.subr.bf16.mxu1 %v5677_v12  ;;  %4096 = vmatprep.subr.bf16.mxu0 %v5680_v14  ;;  %v5737_v4 = vld [vmem:[#allocation4 + $0x88] ss:$28 sps:$4 sm:$0xff]   ;;  %v5741_v7 = vld [vmem:[#allocation4 + $0x280] ss:$28 sps:$4 sm:$0xff]   ;;  %v5738_v6 = vld [vmem:[#allocation4 + $0xb8] ss:$28 sps:$4 sm:$0xff]  }
 0x400   :  { %4026 = vmatprep.mubr.bf16.mxu1 %v6441_v19  ;;  %4112 = vmatprep.mubr.bf16.mxu0 %v6441_v19  ;;  %v5742_v8 = vld [vmem:[#allocation4 + $0xc0] ss:$28 sps:$4 sm:$0xff]   ;;  %v5745_v9 = vld [vmem:[#allocation4 + $0xf4] ss:$28 sps:$4 sm:$0xff]   ;;  %v5750_v13 = vld [vmem:[#allocation4 + $0x12c] ss:$28 sps:$4 sm:$0xff]  }
 0x401   :  { %v5743_v10 = vld [vmem:[#allocation4 + $0xf0] ss:$28 sps:$4 sm:$0xff]   ;;  %v5747_v12 = vld [vmem:[#allocation4 + $0xf8] ss:$28 sps:$4 sm:$0xff]   ;;  %v5748_v15 = vld [vmem:[#allocation4 + $0x128] ss:$28 sps:$4 sm:$0xff]  }
 0x402   :  { %4011 = vmatpush1.bf16.msra.mxu1 %v5675_v20  ;;  %4097 = vmatpush1.bf16.msra.mxu0 %v5678_v21  ;;  %v5751_v14 = vld [vmem:[#allocation4 + $0x2f0] ss:$28 sps:$4 sm:$0xff]   ;;  %v5755_v17 = vld [vmem:[#allocation4 + $0x164] ss:$28 sps:$4 sm:$0xff]  }
 0x403   :  { %4012 = vmatprep.subr.bf16.mxu1 %v5683_v22  ;;  %4098 = vmatprep.subr.bf16.mxu0 %v5686_v23  ;;  %v5752_v16 = vld [vmem:[#allocation4 + $0x130] ss:$28 sps:$4 sm:$0xff]   ;;  %v5756_v11 = vld [vmem:[#allocation4 + $0x328] ss:$28 sps:$4 sm:$0xff]   ;;  %v5753_v20 = vld [vmem:[#allocation4 + $0x160] ss:$28 sps:$4 sm:$0xff]  }
 0x404   :  { %v5757_v21 = vld [vmem:[#allocation4 + $0x168] ss:$28 sps:$4 sm:$0xff]   ;;  %v5760_v22 = vld [vmem:[#allocation4 + $0x19c] ss:$28 sps:$4 sm:$0xff]  }
 0x405   :  { %v5761_v23 = vld [vmem:[#allocation4 + $0x360] ss:$28 sps:$4 sm:$0xff]  }
 0x406   :  { %4013 = vmatpush1.bf16.msra.mxu1 %v5681_v25  ;;  %4099 = vmatpush1.bf16.msra.mxu0 %v5684_v27  ;;  %v5758_v25 = vld [vmem:[#allocation4 + $0x198] ss:$28 sps:$4 sm:$0xff]   ;;  %v5762_v27 = vld [vmem:[#allocation4 + $0x1a0] ss:$28 sps:$4 sm:$0xff]  }
 0x407   :  { %4014 = vmatprep.subr.bf16.mxu1 %v5689_v28  ;;  %4100 = vmatprep.subr.bf16.mxu0 %v5692_v29  ;;  %v5765_v28 = vld [vmem:[#allocation4 + $0x1d4] ss:$28 sps:$4 sm:$0xff]  }
 0x408   :  { %v5766_v29 = vld [vmem:[#allocation4 + $0x558] ss:$28 sps:$4 sm:$0xff]  }
 0x40a   :  { %4015 = vmatpush1.bf16.msra.mxu1 %v5687_v30  ;;  %4101 = vmatpush1.bf16.msra.mxu0 %v5690_v31  ;;  %v5763_v30 = vld [vmem:[#allocation4 + $0x1d0] ss:$28 sps:$4 sm:$0xff]   ;;  %v5767_v31 = vld [vmem:[#allocation4 + $0x398] ss:$28 sps:$4 sm:$0xff]  }
 0x40b   :  { %4016 = vmatprep.subr.bf16.mxu1 %v5695_v32  ;;  %4102 = vmatprep.subr.bf16.mxu0 %v5698_v33  ;;  %v5770_v32 = vld [vmem:[#allocation4 + $0x20c] ss:$28 sps:$4 sm:$0xff]  }
 0x40c   :  { %v5771_v33 = vld [vmem:[#allocation4 + $0x590] ss:$28 sps:$4 sm:$0xff]  }
 0x40e   :  { %4017 = vmatpush1.bf16.msra.mxu1 %v5693_v34  ;;  %4103 = vmatpush1.bf16.msra.mxu0 %v5696_v35  ;;  %v5768_v34 = vld [vmem:[#allocation4 + $0x208] ss:$28 sps:$4 sm:$0xff]   ;;  %v5772_v35 = vld [vmem:[#allocation4 + $0x3d0] ss:$28 sps:$4 sm:$0xff]  }
 0x40f   :  { %4018 = vmatprep.subr.bf16.mxu1 %v5701_v36  ;;  %4104 = vmatprep.subr.bf16.mxu0 %v5704_v37  ;;  %v5775_v36 = vld [vmem:[#allocation4 + $0x244] ss:$28 sps:$4 sm:$0xff]  }
 0x410   :  { %v5776_v37 = vld [vmem:[#allocation4 + $0x5c8] ss:$28 sps:$4 sm:$0xff]  }
 0x412   :  { %4019 = vmatpush1.bf16.msra.mxu1 %v5699_v38  ;;  %4105 = vmatpush1.bf16.msra.mxu0 %v5702_v39  ;;  %v5773_v38 = vld [vmem:[#allocation4 + $0x240] ss:$28 sps:$4 sm:$0xff]   ;;  %v5777_v39 = vld [vmem:[#allocation4 + $0x408] ss:$28 sps:$4 sm:$0xff]  }
 0x413   :  { %4020 = vmatprep.subr.bf16.mxu1 %v5707_v40  ;;  %4106 = vmatprep.subr.bf16.mxu0 %v5710_v41  ;;  %v5780_v40 = vld [vmem:[#allocation4 + $0x27c] ss:$28 sps:$4 sm:$0xff]  }
 0x414   :  { %v5781_v41 = vld [vmem:[#allocation4 + $0x600] ss:$28 sps:$4 sm:$0xff]  }
 0x416   :  { %4021 = vmatpush1.bf16.msra.mxu1 %v5705_v42  ;;  %4107 = vmatpush1.bf16.msra.mxu0 %v5708_v43  ;;  %v5778_v42 = vld [vmem:[#allocation4 + $0x278] ss:$28 sps:$4 sm:$0xff]   ;;  %v5782_v43 = vld [vmem:[#allocation4 + $0x440] ss:$28 sps:$4 sm:$0xff]  }
 0x417   :  { %4022 = vmatprep.subr.bf16.mxu1 %v5713_v44  ;;  %4108 = vmatprep.subr.bf16.mxu0 %v5716_v45  ;;  %v5785_v44 = vld [vmem:[#allocation4 + $0x2b4] ss:$28 sps:$4 sm:$0xff]  }
 0x418   :  { %v5786_v45 = vld [vmem:[#allocation4 + $0x638] ss:$28 sps:$4 sm:$0xff]  }
 0x41a   :  { %4023 = vmatpush1.bf16.msra.mxu1 %v5711_v46  ;;  %4109 = vmatpush1.bf16.msra.mxu0 %v5714_v47  ;;  %v5783_v46 = vld [vmem:[#allocation4 + $0x2b0] ss:$28 sps:$4 sm:$0xff]   ;;  %v5787_v47 = vld [vmem:[#allocation4 + $0x478] ss:$28 sps:$4 sm:$0xff]  }
 0x41b   :  { %4024 = vmatprep.subr.bf16.mxu1 %v5719_v48  ;;  %4110 = vmatprep.subr.bf16.mxu0 %v5722_v49  ;;  %v5790_v48 = vld [vmem:[#allocation4 + $0x2ec] ss:$28 sps:$4 sm:$0xff]  }
 0x41c   :  { %v5791_v49 = vld [vmem:[#allocation4 + $0x670] ss:$28 sps:$4 sm:$0xff]  }
 0x41e   :  { %4025 = vmatpush1.bf16.msra.mxu1 %v5717_v53  ;;  %4111 = vmatpush1.bf16.msra.mxu0 %v5720_v56  ;;  %v5788_v53 = vld [vmem:[#allocation4 + $0x2e8] ss:$28 sps:$4 sm:$0xff]   ;;  %v5792_v56 = vld [vmem:[#allocation4 + $0x4b0] ss:$28 sps:$4 sm:$0xff]  }
 0x41f   :  { %4123 = vmatprep.subr.bf16.mxu1 %v5725_v57  ;;  %4968 = vmatprep.subr.bf16.mxu0 %v5726_v58  ;;  %v5795_v57 = vld [vmem:[#allocation4 + $0x324] ss:$28 sps:$4 sm:$0xff]  }
 0x420   :  { %v5796_v58 = vld [vmem:[#allocation4 + $0x6a8] ss:$28 sps:$4 sm:$0xff]  }
 0x421   :  { %4027 = vmatmul.mubr.bf16.vlgmr.msra.gmra.mrb[12].mxu1 %v6439_v18  ;;  %4113 = vmatmul.mubr.bf16.vlgmr.msra.gmra.mrb[8].mxu0 %v6439_v18 }
 0x422   :  { %4124 = vmatpush1.bf16.msra.mxu1 %v5723_v59  ;;  %4155 = vmatprep.mubr.bf16.mxu1 %v6429_v26  ;;  %v5793_v59 = vld [vmem:[#allocation4 + $0x320] ss:$28 sps:$4 sm:$0xff]  }
 0x423   :  { %4969 = vmatpush3.bf16.msra.mxu0 %v5727_v60  ;;  %4241 = vmatprep.mubr.bf16.mxu0 %v6429_v26  ;;  %v5746_v26 = vld [vmem:[#allocation4 + $0x2b8] ss:$28 sps:$4 sm:$0xff]   ;;  %v5797_v60 = vld [vmem:[#allocation4 + $0x4e8] ss:$28 sps:$4 sm:$0xff]  }
 0x424   :  { %4125 = vmatprep.subr.bf16.mxu1 %v5730_v61  ;;  %4970 = vmatprep.subr.bf16.mxu0 %v5731_v62  ;;  %v5800_v61 = vld [vmem:[#allocation4 + $0x35c] ss:$28 sps:$4 sm:$0xff]  }
 0x425   :  { %v5801_v62 = vld [vmem:[#allocation4 + $0x6e0] ss:$28 sps:$4 sm:$0xff]  }
 0x426   :  { %4126 = vmatpush1.bf16.msra.mxu1 %v5728_v63  ;;  %v5798_v63 = vld [vmem:[#allocation4 + $0x358] ss:$28 sps:$4 sm:$0xff]  }
 0x427   :  { %4971 = vmatpush3.bf16.msra.mxu0 %v5732_v0  ;;  %4127 = vmatprep.subr.bf16.mxu1 %v5735_v1  ;;  %v5802_v0 = vld [vmem:[#allocation4 + $0x520] ss:$28 sps:$4 sm:$0xff]   ;;  %v5805_v1 = vld [vmem:[#allocation4 + $0x394] ss:$28 sps:$4 sm:$0xff]  }
 0x428   :  { %4972 = vmatprep.subr.bf16.mxu0 %v5736_v2  ;;  %v5803_v2 = vld [vmem:[#allocation4 + $0x390] ss:$28 sps:$4 sm:$0xff]  }
 0x42a   :  { %4128 = vmatpush1.bf16.msra.mxu1 %v5733_v3  ;;  %v5808_v3 = vld [vmem:[#allocation4 + $0x3cc] ss:$28 sps:$4 sm:$0xff]  }
 0x42b   :  { %4973 = vmatpush3.bf16.msra.mxu0 %v5737_v4  ;;  %4129 = vmatprep.subr.bf16.mxu1 %v5740_v5  ;;  %v5806_v4 = vld [vmem:[#allocation4 + $0x3c8] ss:$28 sps:$4 sm:$0xff]  }
 0x42c   :  { %4974 = vmatprep.subr.bf16.mxu0 %v5741_v7  ;;  %v5811_v5 = vld [vmem:[#allocation4 + $0x404] ss:$28 sps:$4 sm:$0xff]  }
 0x42d   :  { %v5809_v7 = vld [vmem:[#allocation4 + $0x400] ss:$28 sps:$4 sm:$0xff]  }
 0x42e   :  { %4130 = vmatpush1.bf16.msra.mxu1 %v5738_v6  ;;  %v5814_v6 = vld [vmem:[#allocation4 + $0x43c] ss:$28 sps:$4 sm:$0xff]  }
 0x42f   :  { %4975 = vmatpush3.bf16.msra.mxu0 %v5742_v8  ;;  %4131 = vmatprep.subr.bf16.mxu1 %v5745_v9  ;;  %v5812_v8 = vld [vmem:[#allocation4 + $0x438] ss:$28 sps:$4 sm:$0xff]  }
 0x430   :  { %4976 = vmatprep.subr.bf16.mxu0 %v5746_v26  ;;  %v5817_v9 = vld [vmem:[#allocation4 + $0x474] ss:$28 sps:$4 sm:$0xff]  }
 0x431   :  { %v5815_v26 = vld [vmem:[#allocation4 + $0x470] ss:$28 sps:$4 sm:$0xff]  }
 0x432   :  { %4132 = vmatpush1.bf16.msra.mxu1 %v5743_v10  ;;  %v5818_v10 = vld [vmem:[#allocation4 + $0x4a8] ss:$28 sps:$4 sm:$0xff]  }
 0x433   :  { %4977 = vmatpush3.bf16.msra.mxu0 %v5747_v12  ;;  %4133 = vmatprep.subr.bf16.mxu1 %v5750_v13  ;;  %v5823_v12 = vld [vmem:[#allocation4 + $0x4e4] ss:$28 sps:$4 sm:$0xff]   ;;  %v5826_v13 = vld [vmem:[#allocation4 + $0x51c] ss:$28 sps:$4 sm:$0xff]  }
 0x434   :  { %4978 = vmatprep.subr.bf16.mxu0 %v5751_v14  ;;  %v5824_v14 = vld [vmem:[#allocation4 + $0x518] ss:$28 sps:$4 sm:$0xff]  }
 0x436   :  { %4134 = vmatpush1.bf16.msra.mxu1 %v5748_v15  ;;  %v5829_v15 = vld [vmem:[#allocation4 + $0x554] ss:$28 sps:$4 sm:$0xff]  }
 0x437   :  { %4979 = vmatpush3.bf16.msra.mxu0 %v5752_v16  ;;  %4135 = vmatprep.subr.bf16.mxu1 %v5755_v17  ;;  %v5827_v16 = vld [vmem:[#allocation4 + $0x550] ss:$28 sps:$4 sm:$0xff]  }
 0x438   :  { %4980 = vmatprep.subr.bf16.mxu0 %v5756_v11  ;;  %v5832_v17 = vld [vmem:[#allocation4 + $0x58c] ss:$28 sps:$4 sm:$0xff]  }
 0x439   :  { %v5830_v11 = vld [vmem:[#allocation4 + $0x588] ss:$28 sps:$4 sm:$0xff]  }
 0x43a   :  { %4136 = vmatpush1.bf16.msra.mxu1 %v5753_v20  ;;  %v5835_v20 = vld [vmem:[#allocation4 + $0x5c4] ss:$28 sps:$4 sm:$0xff]  }
 0x43b   :  { %4981 = vmatpush3.bf16.msra.mxu0 %v5757_v21  ;;  %4137 = vmatprep.subr.bf16.mxu1 %v5760_v22  ;;  %v5833_v21 = vld [vmem:[#allocation4 + $0x5c0] ss:$28 sps:$4 sm:$0xff]  }
 0x43c   :  { %4982 = vmatprep.subr.bf16.mxu0 %v5761_v23  ;;  %v5838_v22 = vld [vmem:[#allocation4 + $0x5fc] ss:$28 sps:$4 sm:$0xff]  }
 0x43d   :  { %v5836_v23 = vld [vmem:[#allocation4 + $0x5f8] ss:$28 sps:$4 sm:$0xff]  }
 0x43e   :  { %4138 = vmatpush1.bf16.msra.mxu1 %v5758_v25  ;;  %v5841_v25 = vld [vmem:[#allocation4 + $0x634] ss:$28 sps:$4 sm:$0xff]  }
 0x43f   :  { %4983 = vmatpush3.bf16.msra.mxu0 %v5762_v27  ;;  %4139 = vmatprep.subr.bf16.mxu1 %v5765_v28  ;;  %v5839_v27 = vld [vmem:[#allocation4 + $0x630] ss:$28 sps:$4 sm:$0xff]  }
 0x440   :  { %4990 = vmatprep.subr.bf16.mxu0 %v5766_v29  ;;  %v5844_v28 = vld [vmem:[#allocation4 + $0x66c] ss:$28 sps:$4 sm:$0xff]  }
 0x441   :  { %v5842_v29 = vld [vmem:[#allocation4 + $0x668] ss:$28 sps:$4 sm:$0xff]  }
 0x442   :  { %4242 = vmatmul.mubr.bf16.vlgmr.msra.gmra.mrb[12].mxu0 %v6427_v24  ;;  %4140 = vmatpush1.bf16.msra.mxu1 %v5763_v30  ;;  %v5847_v30 = vld [vmem:[#allocation4 + $0x6a4] ss:$28 sps:$4 sm:$0xff]  }
 0x443   :  { %4991 = vmatpush3.bf16.msra.mxu0 %v5767_v31  ;;  %4282 = vmatprep.mubr.bf16.mxu0 %v6441_v19  ;;  %v5845_v31 = vld [vmem:[#allocation4 + $0x6a0] ss:$28 sps:$4 sm:$0xff]  }
 0x444   :  { %4141 = vmatprep.subr.bf16.mxu1 %v5770_v32  ;;  %4992 = vmatprep.subr.bf16.mxu0 %v5771_v33  ;;  %v5850_v32 = vld [vmem:[#allocation4 + $0x6dc] ss:$28 sps:$4 sm:$0xff]  }
 0x445   :  { %v5848_v33 = vld [vmem:[#allocation4 + $0x6d8] ss:$28 sps:$4 sm:$0xff]  }
 0x446   :  { %4142 = vmatpush1.bf16.msra.mxu1 %v5768_v34  ;;  %v6458_v34 = vld [vmem:[%s6507_s9] sm:$0xff] }
 0x447   :  { %4993 = vmatpush3.bf16.msra.mxu0 %v5772_v35  ;;  %4143 = vmatprep.subr.bf16.mxu1 %v5775_v36  ;;  %v2767_v35 = vrot.slane %v6458_v34, %v6188_v51  ;;  %v2775_v36 = vrot.slane %v6458_v34, %v6191_v52 }
 0x448   :  { %4994 = vmatprep.subr.bf16.mxu0 %v5776_v37  ;;  %v2771_v37 = vrot.slane %v6458_v34, %v6197_v54 }
 0x44a   :  { %4144 = vmatpush1.bf16.msra.mxu1 %v5773_v38  ;;  %v2779_v38 = vrot.slane %v6458_v34, %v6200_v55 }
 0x44b   :  { %4995 = vmatpush3.bf16.msra.mxu0 %v5777_v39  ;;  %4145 = vmatprep.subr.bf16.mxu1 %v5780_v40 }
 0x44c   :  { %4996 = vmatprep.subr.bf16.mxu0 %v5781_v41 }
 0x44e   :  { %4146 = vmatpush1.bf16.msra.mxu1 %v5778_v42 }
 0x44f   :  { %4997 = vmatpush3.bf16.msra.mxu0 %v5782_v43  ;;  %4147 = vmatprep.subr.bf16.mxu1 %v5785_v44 }
 0x450   :  { %4998 = vmatprep.subr.bf16.mxu0 %v5786_v45 }
 0x452   :  { %4148 = vmatpush1.bf16.msra.mxu1 %v5783_v46 }
 0x453   :  { %4999 = vmatpush3.bf16.msra.mxu0 %v5787_v47  ;;  %4149 = vmatprep.subr.bf16.mxu1 %v5790_v48 }
 0x454   :  { %5000 = vmatprep.subr.bf16.mxu0 %v5791_v49 }
 0x456   :  { %4150 = vmatpush1.bf16.msra.mxu1 %v5788_v53 }
 0x457   :  { %5001 = vmatpush3.bf16.msra.mxu0 %v5792_v56  ;;  %4151 = vmatprep.subr.bf16.mxu1 %v5795_v57 }
 0x458   :  { %5002 = vmatprep.subr.bf16.mxu0 %v5796_v58 }
 0x45a   :  { %4152 = vmatpush1.bf16.msra.mxu1 %v5793_v59 }
 0x45b   :  { %5003 = vmatpush3.bf16.msra.mxu0 %v5797_v60  ;;  %4153 = vmatprep.subr.bf16.mxu1 %v5800_v61 }
 0x45c   :  { %5004 = vmatprep.subr.bf16.mxu0 %v5801_v62 }
 0x45e   :  { %4154 = vmatpush1.bf16.msra.mxu1 %v5798_v63 }
 0x45f   :  { %5005 = vmatpush3.bf16.msra.mxu0 %v5802_v0  ;;  %4166 = vmatprep.subr.bf16.mxu1 %v5805_v1 }
 0x461   :  { %4156 = vmatmul.mubr.bf16.vlgmr.msra.gmra.mrb[16].mxu1 %v6427_v24  ;;  %v5820_v24 = vld [vmem:[#allocation4 + $0x4ac] ss:$28 sps:$4 sm:$0xff]  }
 0x462   :  { %4283 = vmatmul.mubr.bf16.vlgmr.msra.gmra.mrb[16].mxu0 %v6439_v18  ;;  %4167 = vmatpush1.bf16.msra.mxu1 %v5803_v2 }
 0x463   :  { %4198 = vmatprep.mubr.bf16.mxu1 %v6441_v19  ;;  %4168 = vmatprep.subr.bf16.mxu1 %v5808_v3  ;;  %v5821_v19 = vld [vmem:[#allocation4 + $0x4e0] ss:$28 sps:$4 sm:$0xff]  }
 0x466   :  { %4169 = vmatpush1.bf16.msra.mxu1 %v5806_v4 }
 0x467   :  { %4170 = vmatprep.subr.bf16.mxu1 %v5811_v5 }
 0x46a   :  { %4171 = vmatpush1.bf16.msra.mxu1 %v5809_v7 }
 0x46b   :  { %4172 = vmatprep.subr.bf16.mxu1 %v5814_v6 }
 0x46e   :  { %4173 = vmatpush1.bf16.msra.mxu1 %v5812_v8 }
 0x46f   :  { %4174 = vmatprep.subr.bf16.mxu1 %v5817_v9 }
 0x472   :  { %4175 = vmatpush1.bf16.msra.mxu1 %v5815_v26 }
 0x473   :  { %4176 = vmatprep.subr.bf16.mxu1 %v5820_v24 }
 0x476   :  { %4177 = vmatpush1.bf16.msra.mxu1 %v5818_v10 }
 0x477   :  { %4178 = vmatprep.subr.bf16.mxu1 %v5823_v12 }
 0x47a   :  { %4179 = vmatpush1.bf16.msra.mxu1 %v5821_v19 }
 0x47b   :  { %4180 = vmatprep.subr.bf16.mxu1 %v5826_v13 }
 0x47e   :  { %4181 = vmatpush1.bf16.msra.mxu1 %v5824_v14 }
 0x47f   :  { %4182 = vmatprep.subr.bf16.mxu1 %v5829_v15 }
 0x482   :  { %4183 = vmatpush1.bf16.msra.mxu1 %v5827_v16 }
 0x483   :  { %4184 = vmatprep.subr.bf16.mxu1 %v5832_v17 }
 0x486   :  { %4185 = vmatpush1.bf16.msra.mxu1 %v5830_v11 }
 0x487   :  { %4186 = vmatprep.subr.bf16.mxu1 %v5835_v20 }
 0x48a   :  { %4187 = vmatpush1.bf16.msra.mxu1 %v5833_v21 }
 0x48b   :  { %4188 = vmatprep.subr.bf16.mxu1 %v5838_v22 }
 0x48e   :  { %4189 = vmatpush1.bf16.msra.mxu1 %v5836_v23 }
 0x48f   :  { %4190 = vmatprep.subr.bf16.mxu1 %v5841_v25 }
 0x492   :  { %4191 = vmatpush1.bf16.msra.mxu1 %v5839_v27 }
 0x493   :  { %4192 = vmatprep.subr.bf16.mxu1 %v5844_v28 }
 0x496   :  { %4193 = vmatpush1.bf16.msra.mxu1 %v5842_v29 }
 0x497   :  { %4194 = vmatprep.subr.bf16.mxu1 %v5847_v30 }
 0x49a   :  { %4195 = vmatpush1.bf16.msra.mxu1 %v5845_v31 }
 0x49b   :  { %4196 = vmatprep.subr.bf16.mxu1 %v5850_v32 }
 0x49e   :  { %4197 = vmatpush1.bf16.msra.mxu1 %v5848_v33 }
 0x4a1   :  { %4199 = vmatmul.mubr.bf16.vlgmr.msra.gmra.mrb[16].mxu1 %v6439_v18 }
 0x4f4   :  { %v4028_v39 = vpop.f32.mrb[12].mxu1  ;;  %v4114_v40 = vpop.f32.mrb[8].mxu0 }
 0x4f5   :  { %v5024_v18 = vadd.f32 %v4028_v39, %v2767_v35  ;;  %v5028_v41 = vadd.f32 %v4114_v40, %v2775_v36  ;;  %v4030_v42 = vpop.f32.mrb[13].mxu1  ;;  %v4116_v43 = vpop.f32.mrb[9].mxu0 }
 0x4f6   :  { %v5025_v44 = vadd.f32 %v4030_v42, %v2771_v37  ;;  %v5029_v45 = vadd.f32 %v4116_v43, %v2779_v38  ;;  %v4032_v46 = vpop.f32.mrb[14].mxu1  ;;  %v4118_v47 = vpop.f32.mrb[10].mxu0  ;;  %v2790_v42 = vsub.s32 6, %v6185_v50 }
 0x4f7   :  { %v4291_v51 = vsub.f32 0.0, %v5024_v18  ;;  %v4293_v48 = vsub.f32 0.0, %v5028_v41  ;;  %v5026_v49 = vadd.f32 %v4032_v46, %v2767_v35  ;;  %v5030_v52 = vadd.f32 %v4118_v47, %v2775_v36  ;;  %v4034_v53 = vpop.f32.mrb[15].mxu1  ;;  %v4120_v56 = vpop.f32.mrb[11].mxu0 }
 0x4f8   :  { %v4292_v54 = vsub.f32 0.0, %v5025_v44  ;;  %v4294_v57 = vsub.f32 0.0, %v5029_v45  ;;  %v5027_v58 = vadd.f32 %v4034_v53, %v2771_v37  ;;  %v5031_v55 = vadd.f32 %v4120_v56, %v2779_v38 }
 0x4f9   :  { %v4305_v59 = vmul.f32 1.442695, %v4291_v51  ;;  %v4309_v60 = vmul.f32 1.442695, %v4293_v48  ;;  %v4298_v61 = vsub.f32 0.0, %v5026_v49  ;;  %v4300_v62 = vsub.f32 0.0, %v5030_v52 }
 0x4fa   :  { %v4307_v63 = vmul.f32 1.442695, %v4292_v54  ;;  %v4311_v0 = vmul.f32 1.442695, %v4294_v57  ;;  %v4299_v1 = vsub.f32 0.0, %v5027_v58  ;;  %v4301_v2 = vsub.f32 0.0, %v5031_v55 }
 0x4fb   :  { %5855 = vpow2.f32 %v4305_v59  ;;  %v4319_v3 = vmul.f32 1.442695, %v4298_v61  ;;  %v4323_v4 = vmul.f32 1.442695, %v4300_v62  ;;  %v2791_v43 = vrot.slane %v6458_v34, %v2790_v42 }
 0x4fc   :  { %5857 = vpow2.f32 %v4309_v60  ;;  %v4321_v5 = vmul.f32 1.442695, %v4299_v1  ;;  %v4325_v7 = vmul.f32 1.442695, %v4301_v2 }
 0x4fd   :  { %5859 = vpow2.f32 %v4307_v63 }
 0x4fe   :  { %5861 = vpow2.f32 %v4311_v0 }
 0x4ff   :  { %5863 = vpow2.f32 %v4319_v3  ;;  %v2782_v3 = vsub.s32 4, %v6185_v50 }
 0x500   :  { %5865 = vpow2.f32 %v4323_v4  ;;  %v2786_v4 = vsub.s32 5, %v6185_v50 }
 0x501   :  { %5867 = vpow2.f32 %v4321_v5  ;;  %v2783_v5 = vrot.slane %v6458_v34, %v2782_v3 }
 0x502   :  { %5869 = vpow2.f32 %v4325_v7  ;;  %v2787_v7 = vrot.slane %v6458_v34, %v2786_v4 }
 0x505   :  { %v5856_v6 = vpop.eup %5855 }
 0x506   :  { %v5858_v8 = vpop.eup %5857  ;;  %v4333_v9 = vadd.f32 1.0, %v5856_v6 }
 0x507   :  { %v5860_v26 = vpop.eup %5859  ;;  %v4335_v24 = vadd.f32 1.0, %v5858_v8 }
 0x508   :  { %v5862_v10 = vpop.eup %5861  ;;  %5871 = vrcp.f32 %v4333_v9  ;;  %v4334_v12 = vadd.f32 1.0, %v5860_v26 }
 0x509   :  { %v5864_v19 = vpop.eup %5863  ;;  %5873 = vrcp.f32 %v4335_v24  ;;  %v4336_v13 = vadd.f32 1.0, %v5862_v10 }
 0x50a   :  { %v5866_v14 = vpop.eup %5865  ;;  %5875 = vrcp.f32 %v4334_v12  ;;  %v4340_v15 = vadd.f32 1.0, %v5864_v19 }
 0x50b   :  { %v5868_v16 = vpop.eup %5867  ;;  %5877 = vrcp.f32 %v4336_v13  ;;  %v4342_v17 = vadd.f32 1.0, %v5866_v14 }
 0x50c   :  { %v5870_v11 = vpop.eup %5869  ;;  %5879 = vrcp.f32 %v4340_v15  ;;  %v4341_v20 = vadd.f32 1.0, %v5868_v16 }
 0x50d   :  { %5881 = vrcp.f32 %v4342_v17  ;;  %v4343_v21 = vadd.f32 1.0, %v5870_v11 }
 0x50e   :  { %5883 = vrcp.f32 %v4341_v20 }
 0x50f   :  { %5885 = vrcp.f32 %v4343_v21 }
 0x512   :  { %v5872_v22 = vpop.eup %5871 }
 0x513   :  { %v5874_v23 = vpop.eup %5873 }
 0x514   :  { %v5876_v25 = vpop.eup %5875 }
 0x515   :  { %v5878_v27 = vpop.eup %5877  ;;  %v4960_v28 = vpack.c.bf16 %v5876_v25, %v5872_v22  ;;  %v4984_v29 = vpop.f32.mrb[12].mxu0 }
 0x516   :  { %v5880_v30 = vpop.eup %5879  ;;  %v4961_v31 = vpack.c.bf16 %v5878_v27, %v5874_v23  ;;  %v4985_v32 = vpop.f32.mrb[13].mxu0 }
 0x517   :  { %v5882_v33 = vpop.eup %5881  ;;  %4405 = vst [vmem:[%s6508_s10] sm:$0xff] %v4960_v28  ;;  %v4986_v35 = vadd.f32 %v4985_v32, %v4984_v29  ;;  %v4987_v36 = vpop.f32.mrb[14].mxu0 }
 0x518   :  { %v5884_v37 = vpop.eup %5883  ;;  %4406 = vst [vmem:[%s6508_s10 + $0x8] sm:$0xff] %v4961_v31  ;;  %v4988_v38 = vpop.f32.mrb[15].mxu0 }
 0x519   :  { %v5886_v39 = vpop.eup %5885  ;;  %v4964_v40 = vpack.c.bf16 %v5884_v37, %v5880_v30  ;;  %v4989_v18 = vadd.f32 %v4988_v38, %v4987_v36  ;;  %v4244_v46 = vadd.f32 %v4986_v35, %v2791_v43 }
 0x51a   :  { %v4965_v41 = vpack.c.bf16 %v5886_v39, %v5882_v33 }
 0x51b   :  { %4409 = vst [vmem:[%s6508_s10 + $0x1c] sm:$0xff] %v4964_v40  ;;  %v4247_v49 = vadd.f32 %v4989_v18, %v2791_v43 }
 0x51c   :  { %4410 = vst [vmem:[%s6508_s10 + $0x24] sm:$0xff] %v4965_v41 }
 0x535   :  { %v5006_v44 = vpop.f32.mrb[16].mxu0 }
 0x536   :  { %v5007_v45 = vpop.f32.mrb[17].mxu0 }
 0x537   :  { %v5008_v47 = vadd.f32 %v5007_v45, %v5006_v44  ;;  %v5009_v51 = vpop.f32.mrb[18].mxu0 }
 0x538   :  { %v5010_v48 = vpop.f32.mrb[19].mxu0 }
 0x539   :  { %v4285_v52 = vadd.f32 %v5008_v47, %v4244_v46  ;;  %v5011_v53 = vadd.f32 %v5010_v48, %v5009_v51 }
 0x53b   :  { %v4297_v56 = vsub.f32 0.0, %v4285_v52  ;;  %v4288_v54 = vadd.f32 %v5011_v53, %v4247_v49 }
 0x53d   :  { %v4317_v57 = vmul.f32 1.442695, %v4297_v56  ;;  %v4304_v58 = vsub.f32 0.0, %v4288_v54 }
 0x53f   :  { %5887 = vpow2.f32 %v4317_v57  ;;  %v4331_v55 = vmul.f32 1.442695, %v4304_v58 }
 0x541   :  { %5889 = vpow2.f32 %v4331_v55 }
 0x549   :  { %v5888_v59 = vpop.eup %5887 }
 0x54a   :  { %v4339_v60 = vadd.f32 1.0, %v5888_v59 }
 0x54b   :  { %v5890_v61 = vpop.eup %5889 }
 0x54c   :  { %5891 = vrcp.f32 %v4339_v60  ;;  %v4346_v62 = vadd.f32 1.0, %v5890_v61 }
 0x54e   :  { %5893 = vrcp.f32 %v4346_v62 }
 0x556   :  { %v5892_v63 = vpop.eup %5891 }
 0x557   :  { %v4963_v0 = vpack.c.bf16 %v5892_v63, %v5892_v63 }
 0x558   :  { %v5894_v1 = vpop.eup %5893 }
 0x559   :  { %4408 = vst [vmem:[%s6508_s10 + $0x18] sm:$0xf] %v4963_v0  ;;  %v4967_v2 = vpack.c.bf16 %v5894_v1, %v5894_v1 }
 0x55b   :  { %4412 = vst [vmem:[%s6508_s10 + $0x34] sm:$0xf] %v4967_v2 }
 0x574   :  { %v4200_v6 = vpop.f32.mrb[16].mxu1 }
 0x575   :  { %v5032_v8 = vadd.f32 %v4200_v6, %v2783_v5  ;;  %v4202_v9 = vpop.f32.mrb[17].mxu1 }
 0x576   :  { %v5033_v26 = vadd.f32 %v4202_v9, %v2787_v7  ;;  %v4204_v24 = vpop.f32.mrb[18].mxu1 }
 0x577   :  { %v4295_v10 = vsub.f32 0.0, %v5032_v8  ;;  %v5034_v12 = vadd.f32 %v4204_v24, %v2783_v5  ;;  %v4206_v19 = vpop.f32.mrb[19].mxu1 }
 0x578   :  { %v4296_v13 = vsub.f32 0.0, %v5033_v26  ;;  %v5035_v14 = vadd.f32 %v4206_v19, %v2787_v7 }
 0x579   :  { %v4313_v15 = vmul.f32 1.442695, %v4295_v10  ;;  %v4302_v16 = vsub.f32 0.0, %v5034_v12 }
 0x57a   :  { %v4315_v17 = vmul.f32 1.442695, %v4296_v13  ;;  %v4303_v11 = vsub.f32 0.0, %v5035_v14 }
 0x57b   :  { %5895 = vpow2.f32 %v4313_v15  ;;  %v4327_v50 = vmul.f32 1.442695, %v4302_v16 }
 0x57c   :  { %5897 = vpow2.f32 %v4315_v17  ;;  %v4329_v20 = vmul.f32 1.442695, %v4303_v11 }
 0x57d   :  { %5899 = vpow2.f32 %v4327_v50 }
 0x57e   :  { %5901 = vpow2.f32 %v4329_v20 }
 0x585   :  { %v5896_v34 = vpop.eup %5895 }
 0x586   :  { %v5898_v21 = vpop.eup %5897  ;;  %v4337_v22 = vadd.f32 1.0, %v5896_v34 }
 0x587   :  { %v5900_v23 = vpop.eup %5899  ;;  %v4338_v25 = vadd.f32 1.0, %v5898_v21 }
 0x588   :  { %v5902_v27 = vpop.eup %5901  ;;  %5903 = vrcp.f32 %v4337_v22  ;;  %v4344_v28 = vadd.f32 1.0, %v5900_v23 }
 0x589   :  { %5905 = vrcp.f32 %v4338_v25  ;;  %v4345_v29 = vadd.f32 1.0, %v5902_v27 }
 0x58a   :  { %5907 = vrcp.f32 %v4344_v28 }
 0x58b   :  { %5909 = vrcp.f32 %v4345_v29 }
 0x592   :  { %v5904_v30 = vpop.eup %5903 }
 0x593   :  { %v5906_v31 = vpop.eup %5905 }
 0x594   :  { %v5908_v32 = vpop.eup %5907  ;;  %v4962_v33 = vpack.c.bf16 %v5906_v31, %v5904_v30 }
 0x595   :  { %v5910_v35 = vpop.eup %5909 }
 0x596   :  { %4407 = vst [vmem:[%s6508_s10 + $0x10] sm:$0xff] %v4962_v33  ;;  %v4966_v36 = vpack.c.bf16 %v5910_v35, %v5908_v32 }
 0x598   :  { %4411 = vst [vmem:[%s6508_s10 + $0x2c] sm:$0xff] %v4966_v36 }
 0x599   :  { %4425 = vsyncpa [#allocation3], 1 }
 0x59a   :  { %4426 = vsyncpa [#allocation5], 1 }

</bundles_post_ra>
